<compile_context>
chip_gen: v7x
topology: tpu7x:2x2x1
jax: 0.10.0
libtpu: 0.0.40
codegen_flags: <defaults>
</compile_context>

<pallas_src>
import numpy as np
import jax
import jax.numpy as jnp
from jax import lax
from jax.experimental import pallas as pl
from jax.experimental.pallas import tpu as pltpu

GRID_W = 11                  # every activation lives on an 11x11 "full width" grid
S_IMG = GRID_W * GRID_W      # 121 valid rows per image
S_STRIDE = 128               # per-image row stride (sublane aligned; rows 121..127 are pad)
PAD_ROWS = 32                # slack rows per block (>= max in-kernel read overrun, 24)
MAX_BT = 8                   # max images per grid step


# ----------------------------- fused Pallas kernel -------------------------------

def _fused_cnn_kernel(x_ref, w1_ref, w2_ref, w3_ref, b1_ref, b2_ref, b3_ref,
                      out_ref, h1_ref, h2_ref):
    # x_ref : (R, 256) f32     input, 4 phases x 64 s2d channels packed in lanes
    # w1_ref: (4, 256, 128) bf16   conv1: one (K=256, N=128) block per row offset
    # w2_ref: (4, 128, 64)  bf16   conv2: one (K=128, N=64) block per row offset
    # w3_ref: (9, 64, 64)   bf16   conv3: 3x3 taps
    # b*_ref: (1, C) f32
    # out_ref: (bt*128, 64) f32    conv3 output (11x11 grid + pad rows; wrapper crops)
    # h1_ref : (R, 128) f32        conv1 output (4 polyphases packed in lanes)
    # h2_ref : (R, 64)  f32        conv2 output
    LS = out_ref.shape[0]                        # bt * 128
    R = h1_ref.shape[0]                          # LS + PAD_ROWS
    bt = LS // S_STRIDE
    C = S_STRIDE

    # Block-end pad rows are read only when computing garbage rows of the last
    # image (cropped by the wrapper) but are never written -> zero them once so
    # every computed value stays finite/deterministic.
    h1_ref[LS:R, :] = jnp.zeros((R - LS, h1_ref.shape[1]), jnp.float32)
    h2_ref[LS:R, :] = jnp.zeros((R - LS, h2_ref.shape[1]), jnp.float32)

    b1 = b1_ref[...]
    b2 = b2_ref[...]
    b3 = b3_ref[...]
    offs12 = (0, 1, GRID_W, GRID_W + 1)          # row offsets used by layers 1 and 2

    # ---- layer 1: 8x8 stride-4 conv == 2x2 conv over the s2d input (K=256 dots) ----
    for t in range(bt):
        base = t * C
        acc = None
        for p in range(4):
            r0 = offs12[p]
            lhs = x_ref[base + r0: base + r0 + C, :].astype(jnp.bfloat16)
            d = jnp.dot(lhs, w1_ref[p], preferred_element_type=jnp.float32)
            acc = d if acc is None else acc + d
        h1_ref[base: base + C, :] = jnp.maximum(acc + b1, 0.0)   # bias + ReLU fused, 1 store

    # ---- layer 2: 4x4 stride-2 conv; stride folded into the h1 polyphase lanes ----
    for t in range(bt):
        base = t * C
        acc = None
        for p in range(4):
            r0 = offs12[p]
            lhs = h1_ref[base + r0: base + r0 + C, :].astype(jnp.bfloat16)
            d = jnp.dot(lhs, w2_ref[p], preferred_element_type=jnp.float32)
            acc = d if acc is None else acc + d
        h2_ref[base: base + C, :] = jnp.maximum(acc + b2, 0.0)

    # ---- layer 3: 3x3 stride-1 conv, accumulated in registers, single store ----
    for t in range(bt):
        base = t * C
        acc = None
        for kh in range(3):
            for kw in range(3):
                r0 = kh * GRID_W + kw
                lhs = h2_ref[base + r0: base + r0 + C, :].astype(jnp.bfloat16)
                d = jnp.dot(lhs, w3_ref[kh * 3 + kw], preferred_element_type=jnp.float32)
                acc = d if acc is None else acc + d
        out_ref[base: base + C, :] = jnp.maximum(acc + b3, 0.0)


# ----------------------------- wrapper-side layout plumbing ----------------------

def _input_phases(x_nchw):
    """(B, 4, 84, 84) f32 -> (B, 128, 256): space-to-depth by 4 (conv1 stride),
    2x2 polyphase split (conv2 stride) packed in lanes (lane = phase*64 + s2d_ch),
    each phase on an 11x11 grid, padded to a 128-row per-image stride."""
    B = x_nchw.shape[0]
    y = jnp.transpose(x_nchw, (0, 2, 3, 1))          # NHWC
    y = y.reshape(B, 21, 4, 21, 4, 4)                # (b, i, dh, j, dw, c)
    y = jnp.transpose(y, (0, 1, 3, 2, 4, 5))         # (b, i, j, dh, dw, c)
    y = y.reshape(B, 21, 21, 64)                     # s2d channel = dh*16 + dw*4 + c
    phases = []
    for a in range(2):
        for b in range(2):
            p = y[:, a::2, b::2, :]
            p = jnp.pad(p, ((0, 0), (0, GRID_W - p.shape[1]),
                            (0, GRID_W - p.shape[2]), (0, 0)))
            phases.append(p)
    xp = jnp.concatenate(phases, axis=-1)            # (B, 11, 11, 256), lane = phase*64+ch
    xp = xp.reshape(B, S_IMG, 256)
    return jnp.pad(xp, ((0, 0), (0, S_STRIDE - S_IMG), (0, 0)))   # (B, 128, 256)


def _pack_blocks(xp, bt):
    """(B_pad, 128, 256) -> (nb*(bt*128+PAD_ROWS), 256): blocks of bt images at a
    fixed 128-row stride + PAD_ROWS zero slack rows per block."""
    B = xp.shape[0]
    nb = B // bt
    z = xp.reshape(nb, bt * S_STRIDE, 256)
    z = jnp.pad(z, ((0, 0), (0, PAD_ROWS), (0, 0)))
    return z.reshape(nb * (bt * S_STRIDE + PAD_ROWS), 256)


def _prep_weights(params):
    """Reorder / zero-stack conv weights for the in-kernel lane layouts (bf16)."""
    f32 = jnp.float32
    # conv1: 8x8 stride-4 == 2x2 stride-1 over the s2d input.  Per row offset
    # (Rh,Rw) build a (256,128) block: K = src_phase*64 + s2d_ch, N = out_phase*32 + co.
    w1 = params["w1"].reshape(32, 4, 2, 4, 2, 4)     # (co, c, qh, dh, qw, dw)
    w1 = jnp.transpose(w1, (2, 4, 3, 5, 1, 0))       # (qh, qw, dh, dw, c, co)
    w1 = w1.reshape(2, 2, 64, 32).astype(f32)        # tap (qh,qw): (K=64, co=32)
    zeros = jnp.zeros((64, 32), f32)
    w1_blocks = []
    for Rh in range(2):
        for Rw in range(2):
            rows = []
            for src in range(4):                     # input phase (a, b)
                a, b = src // 2, src % 2
                cols = []
                for ph in range(2):                  # conv1 output phase (ph, pw)
                    for pw in range(2):
                        qh = 2 * Rh + a - ph
                        qw = 2 * Rw + b - pw
                        ok = (0 <= qh <= 1) and (0 <= qw <= 1)
                        cols.append(w1[qh, qw] if ok else zeros)
                rows.append(jnp.concatenate(cols, axis=1))      # (64, 128)
            w1_blocks.append(jnp.concatenate(rows, axis=0))     # (256, 128)
    w1p = jnp.stack(w1_blocks).astype(jnp.bfloat16)             # (4, 256, 128)

    # conv2: 4x4 stride-2; the 4 taps sharing a row offset stacked on K in phase order.
    w2 = jnp.transpose(params["w2"], (2, 3, 1, 0)).astype(f32)  # (kh, kw, ci, co)
    w2_blocks = []
    for Rh in range(2):
        for Rw in range(2):
            rows = [w2[2 * Rh + (src // 2), 2 * Rw + (src % 2)] for src in range(4)]
            w2_blocks.append(jnp.concatenate(rows, axis=0))     # (128, 64)
    w2p = jnp.stack(w2_blocks).astype(jnp.bfloat16)             # (4, 128, 64)

    w3p = jnp.transpose(params["w3"], (2, 3, 1, 0)).reshape(9, 64, 64).astype(jnp.bfloat16)

    b1 = jnp.tile(params["b1"].reshape(1, 32), (1, 4)).astype(f32)  # lanes = phase*32 + co
    b2 = params["b2"].reshape(1, 64).astype(f32)
    b3 = params["b3"].reshape(1, 64).astype(f32)
    return w1p, w2p, w3p, b1, b2, b3


def _pick_bt(B):
    """Images per grid step: >= 2 grid steps whenever B >= 2 (keeps both v7x TCs busy)."""
    if B <= 2 * MAX_BT:
        return max(1, (B + 1) // 2)
    return MAX_BT


# ----------------------------- forward --------------------------------------------

@jax.jit
def preprocess_image_forward(state, params):
    x = state.astype(jnp.float32)                    # state.float()
    B = x.shape[0]
    bt = _pick_bt(B)
    B_pad = ((B + bt - 1) // bt) * bt
    if B_pad != B:
        x = jnp.pad(x, ((0, B_pad - B), (0, 0), (0, 0), (0, 0)))
    nb = B_pad // bt
    LS = bt * S_STRIDE
    R = LS + PAD_ROWS

    xp = _pack_blocks(_input_phases(x), bt)          # (nb*R, 256) f32
    w1, w2, w3, b1, b2, b3 = _prep_weights(params)

    out_flat = pl.pallas_call(
        _fused_cnn_kernel,
        out_shape=jax.ShapeDtypeStruct((nb * LS, 64), jnp.float32),
        grid_spec=pltpu.PrefetchScalarGridSpec(
            num_scalar_prefetch=0,
            grid=(nb,),
            in_specs=[
                pl.BlockSpec((R, 256), lambda i: (i, 0)),        # input block (lane-dense)
                pl.BlockSpec((4, 256, 128), lambda i: (0, 0, 0)),  # conv1 weights (resident)
                pl.BlockSpec((4, 128, 64), lambda i: (0, 0, 0)),   # conv2 weights
                pl.BlockSpec((9, 64, 64), lambda i: (0, 0, 0)),    # conv3 weights
                pl.BlockSpec((1, 128), lambda i: (0, 0)),          # biases
                pl.BlockSpec((1, 64), lambda i: (0, 0)),
                pl.BlockSpec((1, 64), lambda i: (0, 0)),
            ],
            out_specs=pl.BlockSpec((LS, 64), lambda i: (i, 0)),
            scratch_shapes=[
                pltpu.VMEM((R, 128), jnp.float32),   # conv1 output (phases in lanes)
                pltpu.VMEM((R, 64), jnp.float32),    # conv2 output
            ],
        ),
        compiler_params=pltpu.CompilerParams(
            dimension_semantics=("parallel",),        # batch blocks: pipelined + megacore
            vmem_limit_bytes=32 * 1024 * 1024,
        ),
    )(xp, w1, w2, w3, b1, b2, b3)

    # crop the 128-row / 11x11 full-width grid to the valid 7x7 window, NCHW flatten
    h3 = out_flat.reshape(B_pad, S_STRIDE, 64)[:B, :S_IMG, :]
    h3 = h3.reshape(B, GRID_W, GRID_W, 64)[:, :7, :7, :]
    h3 = jnp.transpose(h3, (0, 3, 1, 2))             # (B, 64, 7, 7) == PyTorch NCHW
    return h3.reshape(B, 64 * 7 * 7)                 # nn.Flatten -> (B, 3136)


# ----------------------------- parameters ------------------------------------------

def orthogonal_init(key, shape, scale):
    """Mimics torch.nn.init.orthogonal_(weight, gain=scale): flatten dims > 0."""
    flat = (shape[0], int(np.prod(shape[1:])))
    a = jax.random.normal(key, (max(flat), min(flat)), jnp.float32)
    q, r = jnp.linalg.qr(a)
    q = q * jnp.sign(jnp.diag(r))
    if flat[0] < flat[1]:
        q = q.T
    return (scale * q).reshape(shape).astype(jnp.float32)


def init_params(key, frames=4):
    k1, k2, k3 = jax.random.split(key, 3)
    std = float(np.sqrt(2.0))
    return {
        "w1": orthogonal_init(k1, (32, frames, 8, 8), std),
        "b1": jnp.zeros((32,), jnp.float32),
        "w2": orthogonal_init(k2, (64, 32, 4, 4), std),
        "b2": jnp.zeros((64,), jnp.float32),
        "w3": orthogonal_init(k3, (64, 64, 3, 3), std),
        "b3": jnp.zeros((64,), jnp.float32),
    }


# ----------------------------- references ------------------------------------------

def _conv_relu_ref(x, w, b, s):
    y = lax.conv_general_dilated(
        x, w, (s, s), "VALID",
        dimension_numbers=("NCHW", "OIHW", "NCHW"),
        precision=lax.Precision.HIGHEST)
    return jnp.maximum(y + b[None, :, None, None], 0.0)


def _forward_ref(state, params):
    x = state.astype(jnp.float32)
    x = _conv_relu_ref(x, params["w1"], params["b1"], 4)
    x = _conv_relu_ref(x, params["w2"], params["b2"], 2)
    x = _conv_relu_ref(x, params["w3"], params["b3"], 1)
    return x.reshape(x.shape[0], -1)


def _forward_ref_bf16(state, params):
    """Mirrors the kernel numerics: bf16 operands into every matmul, f32 accumulation."""
    rd = lambda t: t.astype(jnp.bfloat16).astype(jnp.float32)
    x = rd(state.astype(jnp.float32))
    x = rd(_conv_relu_ref(x, rd(params["w1"]), params["b1"], 4))
    x = rd(_conv_relu_ref(x, rd(params["w2"]), params["b2"], 2))
    x = _conv_relu_ref(x, rd(params["w3"]), params["b3"], 1)
    return x.reshape(x.shape[0], -1)


def _max_rel_err(a, b):
    a = np.asarray(a, dtype=np.float64)
    b = np.asarray(b, dtype=np.float64)
    return float(np.max(np.abs(a - b)) / (np.max(np.abs(b)) + 1e-30))


if __name__ == "__main__":
    key = jax.random.PRNGKey(0)
    k_param, k_data = jax.random.split(key)

    params = init_params(k_param, frames=4)

    # batch=2, frames=4, 84x84 (the spatial size implied by unpack_size=3136)
    state = jax.random.uniform(k_data, (2, 4, 84, 84),
                               dtype=jnp.float32, minval=0.0, maxval=255.0)
    out = jax.block_until_ready(preprocess_image_forward(state, params))
    assert out.shape == (2, 3136), out.shape

    err_bf16 = _max_rel_err(out, _forward_ref_bf16(state, params))
    err_f32 = _max_rel_err(out, _forward_ref(state, params))
    assert err_bf16 < 2e-3, f"mismatch vs bf16-rounded reference: {err_bf16}"
    assert err_f32 < 5e-2, f"mismatch vs f32 reference: {err_f32}"

    # multi-block production tiling (grid > 1, bt = 8)
    state16 = jax.random.uniform(jax.random.PRNGKey(1), (16, 4, 84, 84),
                                 dtype=jnp.float32, minval=0.0, maxval=255.0)
    out16 = jax.block_until_ready(preprocess_image_forward(state16, params))
    assert out16.shape == (16, 3136), out16.shape
    err16 = _max_rel_err(out16, _forward_ref_bf16(state16, params))
    assert err16 < 2e-3, f"mismatch (multi-block) vs bf16 reference: {err16}"

    print("KERNEL_OK")
</pallas_src>

<mosaic_0001>
module attributes {stable_mosaic.version = 11 : i64} {
  func.func @_fused_cnn_kernel(%arg0: i32, %arg1: memref<160x256xf32, #tpu.memory_space<vmem>>, %arg2: memref<4x256x128xbf16, #tpu.memory_space<vmem>>, %arg3: memref<4x128x64xbf16, #tpu.memory_space<vmem>>, %arg4: memref<9x64x64xbf16, #tpu.memory_space<vmem>>, %arg5: memref<1x128xf32, #tpu.memory_space<vmem>>, %arg6: memref<1x64xf32, #tpu.memory_space<vmem>>, %arg7: memref<1x64xf32, #tpu.memory_space<vmem>>, %arg8: memref<128x64xf32, #tpu.memory_space<vmem>>, %arg9: memref<160x128xf32, #tpu.memory_space<vmem>>, %arg10: memref<160x64xf32, #tpu.memory_space<vmem>>) attributes {dimension_semantics = [#tpu.dimension_semantics<parallel>], iteration_bounds = array<i64: 2>, scalar_prefetch = 0 : i64, scratch_operands = 2 : i64, tpu.core_type = #tpu.core_type<tc>, window_params = [{transform_indices = @transform_0, window_bounds = array<i64: 160, 256>}, {pipeline_mode = #tpu.pipeline_mode<synchronous>, transform_indices = @transform_1, window_bounds = array<i64: 4, 256, 128>}, {pipeline_mode = #tpu.pipeline_mode<synchronous>, transform_indices = @transform_2, window_bounds = array<i64: 4, 128, 64>}, {pipeline_mode = #tpu.pipeline_mode<synchronous>, transform_indices = @transform_3, window_bounds = array<i64: 9, 64, 64>}, {pipeline_mode = #tpu.pipeline_mode<synchronous>, transform_indices = @transform_4, window_bounds = array<i64: 1, 128>}, {pipeline_mode = #tpu.pipeline_mode<synchronous>, transform_indices = @transform_5, window_bounds = array<i64: 1, 64>}, {pipeline_mode = #tpu.pipeline_mode<synchronous>, transform_indices = @transform_6, window_bounds = array<i64: 1, 64>}, {transform_indices = @transform_7, window_bounds = array<i64: 128, 64>}]} {
    %cst = arith.constant 0.000000e+00 : f32
    %0 = vector.broadcast %cst : f32 to vector<32x128xf32>
    %c128 = arith.constant 128 : index
    %c0 = arith.constant 0 : index
    %1 = vector.load %arg9[%c128, %c0] : memref<160x128xf32, #tpu.memory_space<vmem>>, vector<32x128xf32>
    tpu.vector_store %arg9[%c128, %c0], %0 {strides = array<i32>} : memref<160x128xf32, #tpu.memory_space<vmem>>, vector<32x128xf32>,
    %cst_0 = arith.constant 0.000000e+00 : f32
    %2 = vector.broadcast %cst_0 : f32 to vector<32x64xf32>
    %c128_1 = arith.constant 128 : index
    %c0_2 = arith.constant 0 : index
    %3 = vector.load %arg10[%c128_1, %c0_2] : memref<160x64xf32, #tpu.memory_space<vmem>>, vector<32x64xf32>
    tpu.vector_store %arg10[%c128_1, %c0_2], %2 {strides = array<i32>} : memref<160x64xf32, #tpu.memory_space<vmem>>, vector<32x64xf32>,
    %c0_3 = arith.constant 0 : index
    %c0_4 = arith.constant 0 : index
    %4 = vector.load %arg5[%c0_3, %c0_4] : memref<1x128xf32, #tpu.memory_space<vmem>>, vector<1x128xf32>
    %c0_5 = arith.constant 0 : index
    %c0_6 = arith.constant 0 : index
    %5 = vector.load %arg6[%c0_5, %c0_6] : memref<1x64xf32, #tpu.memory_space<vmem>>, vector<1x64xf32>
    %c0_7 = arith.constant 0 : index
    %c0_8 = arith.constant 0 : index
    %6 = vector.load %arg7[%c0_7, %c0_8] : memref<1x64xf32, #tpu.memory_space<vmem>>, vector<1x64xf32>
    %c0_9 = arith.constant 0 : index
    %c0_10 = arith.constant 0 : index
    %7 = vector.load %arg1[%c0_9, %c0_10] : memref<160x256xf32, #tpu.memory_space<vmem>>, vector<128x256xf32>
    %8 = arith.truncf %7 : vector<128x256xf32> to vector<128x256xbf16>
    %c0_11 = arith.constant 0 : index
    %c0_12 = arith.constant 0 : index
    %c0_13 = arith.constant 0 : index
    %9 = vector.load %arg2[%c0_11, %c0_12, %c0_13] : memref<4x256x128xbf16, #tpu.memory_space<vmem>>, vector<1x256x128xbf16>
    %10 = vector.shape_cast %9 : vector<1x256x128xbf16> to vector<256x128xbf16>
    %cst_14 = arith.constant dense<0.000000e+00> : vector<128x128xf32>
    %11 = tpu.matmul %8, %10, %cst_14 {dimension_numbers = #tpu.dot_dimension_numbers<[1], [0], [0], [1], [0, 0, 1, 1], [], []>} : vector<128x256xbf16>, vector<256x128xbf16>, vector<128x128xf32> -> vector<128x128xf32>
    %c1 = arith.constant 1 : index
    %c0_15 = arith.constant 0 : index
    %12 = vector.load %arg1[%c1, %c0_15] : memref<160x256xf32, #tpu.memory_space<vmem>>, vector<128x256xf32>
    %13 = arith.truncf %12 : vector<128x256xf32> to vector<128x256xbf16>
    %c1_16 = arith.constant 1 : index
    %c0_17 = arith.constant 0 : index
    %c0_18 = arith.constant 0 : index
    %14 = vector.load %arg2[%c1_16, %c0_17, %c0_18] : memref<4x256x128xbf16, #tpu.memory_space<vmem>>, vector<1x256x128xbf16>
    %15 = vector.shape_cast %14 : vector<1x256x128xbf16> to vector<256x128xbf16>
    %cst_19 = arith.constant dense<0.000000e+00> : vector<128x128xf32>
    %16 = tpu.matmul %13, %15, %cst_19 {dimension_numbers = #tpu.dot_dimension_numbers<[1], [0], [0], [1], [0, 0, 1, 1], [], []>} : vector<128x256xbf16>, vector<256x128xbf16>, vector<128x128xf32> -> vector<128x128xf32>
    %17 = arith.addf %11, %16 : vector<128x128xf32>
    %c11 = arith.constant 11 : index
    %c0_20 = arith.constant 0 : index
    %18 = vector.load %arg1[%c11, %c0_20] : memref<160x256xf32, #tpu.memory_space<vmem>>, vector<128x256xf32>
    %19 = arith.truncf %18 : vector<128x256xf32> to vector<128x256xbf16>
    %c2 = arith.constant 2 : index
    %c0_21 = arith.constant 0 : index
    %c0_22 = arith.constant 0 : index
    %20 = vector.load %arg2[%c2, %c0_21, %c0_22] : memref<4x256x128xbf16, #tpu.memory_space<vmem>>, vector<1x256x128xbf16>
    %21 = vector.shape_cast %20 : vector<1x256x128xbf16> to vector<256x128xbf16>
    %cst_23 = arith.constant dense<0.000000e+00> : vector<128x128xf32>
    %22 = tpu.matmul %19, %21, %cst_23 {dimension_numbers = #tpu.dot_dimension_numbers<[1], [0], [0], [1], [0, 0, 1, 1], [], []>} : vector<128x256xbf16>, vector<256x128xbf16>, vector<128x128xf32> -> vector<128x128xf32>
    %23 = arith.addf %17, %22 : vector<128x128xf32>
    %c12 = arith.constant 12 : index
    %c0_24 = arith.constant 0 : index
    %24 = vector.load %arg1[%c12, %c0_24] : memref<160x256xf32, #tpu.memory_space<vmem>>, vector<128x256xf32>
    %25 = arith.truncf %24 : vector<128x256xf32> to vector<128x256xbf16>
    %c3 = arith.constant 3 : index
    %c0_25 = arith.constant 0 : index
    %c0_26 = arith.constant 0 : index
    %26 = vector.load %arg2[%c3, %c0_25, %c0_26] : memref<4x256x128xbf16, #tpu.memory_space<vmem>>, vector<1x256x128xbf16>
    %27 = vector.shape_cast %26 : vector<1x256x128xbf16> to vector<256x128xbf16>
    %cst_27 = arith.constant dense<0.000000e+00> : vector<128x128xf32>
    %28 = tpu.matmul %25, %27, %cst_27 {dimension_numbers = #tpu.dot_dimension_numbers<[1], [0], [0], [1], [0, 0, 1, 1], [], []>} : vector<128x256xbf16>, vector<256x128xbf16>, vector<128x128xf32> -> vector<128x128xf32>
    %29 = arith.addf %23, %28 : vector<128x128xf32>
    %30 = vector.broadcast %4 : vector<1x128xf32> to vector<128x128xf32>
    %31 = arith.addf %29, %30 : vector<128x128xf32>
    %cst_28 = arith.constant 0.000000e+00 : f32
    %32 = vector.broadcast %cst_28 : f32 to vector<128x128xf32>
    %33 = arith.maximumf %31, %32 : vector<128x128xf32>
    %c0_29 = arith.constant 0 : index
    %c0_30 = arith.constant 0 : index
    %34 = vector.load %arg9[%c0_29, %c0_30] : memref<160x128xf32, #tpu.memory_space<vmem>>, vector<128x128xf32>
    tpu.vector_store %arg9[%c0_29, %c0_30], %33 {strides = array<i32>} : memref<160x128xf32, #tpu.memory_space<vmem>>, vector<128x128xf32>,
    %c0_31 = arith.constant 0 : index
    %c0_32 = arith.constant 0 : index
    %35 = vector.load %arg9[%c0_31, %c0_32] : memref<160x128xf32, #tpu.memory_space<vmem>>, vector<128x128xf32>
    %36 = arith.truncf %35 : vector<128x128xf32> to vector<128x128xbf16>
    %c0_33 = arith.constant 0 : index
    %c0_34 = arith.constant 0 : index
    %c0_35 = arith.constant 0 : index
    %37 = vector.load %arg3[%c0_33, %c0_34, %c0_35] : memref<4x128x64xbf16, #tpu.memory_space<vmem>>, vector<1x128x64xbf16>
    %38 = vector.shape_cast %37 : vector<1x128x64xbf16> to vector<128x64xbf16>
    %cst_36 = arith.constant dense<0.000000e+00> : vector<128x64xf32>
    %39 = tpu.matmul %36, %38, %cst_36 {dimension_numbers = #tpu.dot_dimension_numbers<[1], [0], [0], [1], [0, 0, 1, 1], [], []>} : vector<128x128xbf16>, vector<128x64xbf16>, vector<128x64xf32> -> vector<128x64xf32>
    %c1_37 = arith.constant 1 : index
    %c0_38 = arith.constant 0 : index
    %40 = vector.load %arg9[%c1_37, %c0_38] : memref<160x128xf32, #tpu.memory_space<vmem>>, vector<128x128xf32>
    %41 = arith.truncf %40 : vector<128x128xf32> to vector<128x128xbf16>
    %c1_39 = arith.constant 1 : index
    %c0_40 = arith.constant 0 : index
    %c0_41 = arith.constant 0 : index
    %42 = vector.load %arg3[%c1_39, %c0_40, %c0_41] : memref<4x128x64xbf16, #tpu.memory_space<vmem>>, vector<1x128x64xbf16>
    %43 = vector.shape_cast %42 : vector<1x128x64xbf16> to vector<128x64xbf16>
    %cst_42 = arith.constant dense<0.000000e+00> : vector<128x64xf32>
    %44 = tpu.matmul %41, %43, %cst_42 {dimension_numbers = #tpu.dot_dimension_numbers<[1], [0], [0], [1], [0, 0, 1, 1], [], []>} : vector<128x128xbf16>, vector<128x64xbf16>, vector<128x64xf32> -> vector<128x64xf32>
    %45 = arith.addf %39, %44 : vector<128x64xf32>
    %c11_43 = arith.constant 11 : index
    %c0_44 = arith.constant 0 : index
    %46 = vector.load %arg9[%c11_43, %c0_44] : memref<160x128xf32, #tpu.memory_space<vmem>>, vector<128x128xf32>
    %47 = arith.truncf %46 : vector<128x128xf32> to vector<128x128xbf16>
    %c2_45 = arith.constant 2 : index
    %c0_46 = arith.constant 0 : index
    %c0_47 = arith.constant 0 : index
    %48 = vector.load %arg3[%c2_45, %c0_46, %c0_47] : memref<4x128x64xbf16, #tpu.memory_space<vmem>>, vector<1x128x64xbf16>
    %49 = vector.shape_cast %48 : vector<1x128x64xbf16> to vector<128x64xbf16>
    %cst_48 = arith.constant dense<0.000000e+00> : vector<128x64xf32>
    %50 = tpu.matmul %47, %49, %cst_48 {dimension_numbers = #tpu.dot_dimension_numbers<[1], [0], [0], [1], [0, 0, 1, 1], [], []>} : vector<128x128xbf16>, vector<128x64xbf16>, vector<128x64xf32> -> vector<128x64xf32>
    %51 = arith.addf %45, %50 : vector<128x64xf32>
    %c12_49 = arith.constant 12 : index
    %c0_50 = arith.constant 0 : index
    %52 = vector.load %arg9[%c12_49, %c0_50] : memref<160x128xf32, #tpu.memory_space<vmem>>, vector<128x128xf32>
    %53 = arith.truncf %52 : vector<128x128xf32> to vector<128x128xbf16>
    %c3_51 = arith.constant 3 : index
    %c0_52 = arith.constant 0 : index
    %c0_53 = arith.constant 0 : index
    %54 = vector.load %arg3[%c3_51, %c0_52, %c0_53] : memref<4x128x64xbf16, #tpu.memory_space<vmem>>, vector<1x128x64xbf16>
    %55 = vector.shape_cast %54 : vector<1x128x64xbf16> to vector<128x64xbf16>
    %cst_54 = arith.constant dense<0.000000e+00> : vector<128x64xf32>
    %56 = tpu.matmul %53, %55, %cst_54 {dimension_numbers = #tpu.dot_dimension_numbers<[1], [0], [0], [1], [0, 0, 1, 1], [], []>} : vector<128x128xbf16>, vector<128x64xbf16>, vector<128x64xf32> -> vector<128x64xf32>
    %57 = arith.addf %51, %56 : vector<128x64xf32>
    %58 = vector.broadcast %5 : vector<1x64xf32> to vector<128x64xf32>
    %59 = arith.addf %57, %58 : vector<128x64xf32>
    %cst_55 = arith.constant 0.000000e+00 : f32
    %60 = vector.broadcast %cst_55 : f32 to vector<128x64xf32>
    %61 = arith.maximumf %59, %60 : vector<128x64xf32>
    %c0_56 = arith.constant 0 : index
    %c0_57 = arith.constant 0 : index
    %62 = vector.load %arg10[%c0_56, %c0_57] : memref<160x64xf32, #tpu.memory_space<vmem>>, vector<128x64xf32>
    tpu.vector_store %arg10[%c0_56, %c0_57], %61 {strides = array<i32>} : memref<160x64xf32, #tpu.memory_space<vmem>>, vector<128x64xf32>,
    %c0_58 = arith.constant 0 : index
    %c0_59 = arith.constant 0 : index
    %63 = vector.load %arg10[%c0_58, %c0_59] : memref<160x64xf32, #tpu.memory_space<vmem>>, vector<128x64xf32>
    %64 = arith.truncf %63 : vector<128x64xf32> to vector<128x64xbf16>
    %c0_60 = arith.constant 0 : index
    %c0_61 = arith.constant 0 : index
    %c0_62 = arith.constant 0 : index
    %65 = vector.load %arg4[%c0_60, %c0_61, %c0_62] : memref<9x64x64xbf16, #tpu.memory_space<vmem>>, vector<1x64x64xbf16>
    %66 = vector.shape_cast %65 : vector<1x64x64xbf16> to vector<64x64xbf16>
    %cst_63 = arith.constant dense<0.000000e+00> : vector<128x64xf32>
    %67 = tpu.matmul %64, %66, %cst_63 {dimension_numbers = #tpu.dot_dimension_numbers<[1], [0], [0], [1], [0, 0, 1, 1], [], []>} : vector<128x64xbf16>, vector<64x64xbf16>, vector<128x64xf32> -> vector<128x64xf32>
    %c1_64 = arith.constant 1 : index
    %c0_65 = arith.constant 0 : index
    %68 = vector.load %arg10[%c1_64, %c0_65] : memref<160x64xf32, #tpu.memory_space<vmem>>, vector<128x64xf32>
    %69 = arith.truncf %68 : vector<128x64xf32> to vector<128x64xbf16>
    %c1_66 = arith.constant 1 : index
    %c0_67 = arith.constant 0 : index
    %c0_68 = arith.constant 0 : index
    %70 = vector.load %arg4[%c1_66, %c0_67, %c0_68] : memref<9x64x64xbf16, #tpu.memory_space<vmem>>, vector<1x64x64xbf16>
    %71 = vector.shape_cast %70 : vector<1x64x64xbf16> to vector<64x64xbf16>
    %cst_69 = arith.constant dense<0.000000e+00> : vector<128x64xf32>
    %72 = tpu.matmul %69, %71, %cst_69 {dimension_numbers = #tpu.dot_dimension_numbers<[1], [0], [0], [1], [0, 0, 1, 1], [], []>} : vector<128x64xbf16>, vector<64x64xbf16>, vector<128x64xf32> -> vector<128x64xf32>
    %73 = arith.addf %67, %72 : vector<128x64xf32>
    %c2_70 = arith.constant 2 : index
    %c0_71 = arith.constant 0 : index
    %74 = vector.load %arg10[%c2_70, %c0_71] : memref<160x64xf32, #tpu.memory_space<vmem>>, vector<128x64xf32>
    %75 = arith.truncf %74 : vector<128x64xf32> to vector<128x64xbf16>
    %c2_72 = arith.constant 2 : index
    %c0_73 = arith.constant 0 : index
    %c0_74 = arith.constant 0 : index
    %76 = vector.load %arg4[%c2_72, %c0_73, %c0_74] : memref<9x64x64xbf16, #tpu.memory_space<vmem>>, vector<1x64x64xbf16>
    %77 = vector.shape_cast %76 : vector<1x64x64xbf16> to vector<64x64xbf16>
    %cst_75 = arith.constant dense<0.000000e+00> : vector<128x64xf32>
    %78 = tpu.matmul %75, %77, %cst_75 {dimension_numbers = #tpu.dot_dimension_numbers<[1], [0], [0], [1], [0, 0, 1, 1], [], []>} : vector<128x64xbf16>, vector<64x64xbf16>, vector<128x64xf32> -> vector<128x64xf32>
    %79 = arith.addf %73, %78 : vector<128x64xf32>
    %c11_76 = arith.constant 11 : index
    %c0_77 = arith.constant 0 : index
    %80 = vector.load %arg10[%c11_76, %c0_77] : memref<160x64xf32, #tpu.memory_space<vmem>>, vector<128x64xf32>
    %81 = arith.truncf %80 : vector<128x64xf32> to vector<128x64xbf16>
    %c3_78 = arith.constant 3 : index
    %c0_79 = arith.constant 0 : index
    %c0_80 = arith.constant 0 : index
    %82 = vector.load %arg4[%c3_78, %c0_79, %c0_80] : memref<9x64x64xbf16, #tpu.memory_space<vmem>>, vector<1x64x64xbf16>
    %83 = vector.shape_cast %82 : vector<1x64x64xbf16> to vector<64x64xbf16>
    %cst_81 = arith.constant dense<0.000000e+00> : vector<128x64xf32>
    %84 = tpu.matmul %81, %83, %cst_81 {dimension_numbers = #tpu.dot_dimension_numbers<[1], [0], [0], [1], [0, 0, 1, 1], [], []>} : vector<128x64xbf16>, vector<64x64xbf16>, vector<128x64xf32> -> vector<128x64xf32>
    %85 = arith.addf %79, %84 : vector<128x64xf32>
    %c12_82 = arith.constant 12 : index
    %c0_83 = arith.constant 0 : index
    %86 = vector.load %arg10[%c12_82, %c0_83] : memref<160x64xf32, #tpu.memory_space<vmem>>, vector<128x64xf32>
    %87 = arith.truncf %86 : vector<128x64xf32> to vector<128x64xbf16>
    %c4 = arith.constant 4 : index
    %c0_84 = arith.constant 0 : index
    %c0_85 = arith.constant 0 : index
    %88 = vector.load %arg4[%c4, %c0_84, %c0_85] : memref<9x64x64xbf16, #tpu.memory_space<vmem>>, vector<1x64x64xbf16>
    %89 = vector.shape_cast %88 : vector<1x64x64xbf16> to vector<64x64xbf16>
    %cst_86 = arith.constant dense<0.000000e+00> : vector<128x64xf32>
    %90 = tpu.matmul %87, %89, %cst_86 {dimension_numbers = #tpu.dot_dimension_numbers<[1], [0], [0], [1], [0, 0, 1, 1], [], []>} : vector<128x64xbf16>, vector<64x64xbf16>, vector<128x64xf32> -> vector<128x64xf32>
    %91 = arith.addf %85, %90 : vector<128x64xf32>
    %c13 = arith.constant 13 : index
    %c0_87 = arith.constant 0 : index
    %92 = vector.load %arg10[%c13, %c0_87] : memref<160x64xf32, #tpu.memory_space<vmem>>, vector<128x64xf32>
    %93 = arith.truncf %92 : vector<128x64xf32> to vector<128x64xbf16>
    %c5 = arith.constant 5 : index
    %c0_88 = arith.constant 0 : index
    %c0_89 = arith.constant 0 : index
    %94 = vector.load %arg4[%c5, %c0_88, %c0_89] : memref<9x64x64xbf16, #tpu.memory_space<vmem>>, vector<1x64x64xbf16>
    %95 = vector.shape_cast %94 : vector<1x64x64xbf16> to vector<64x64xbf16>
    %cst_90 = arith.constant dense<0.000000e+00> : vector<128x64xf32>
    %96 = tpu.matmul %93, %95, %cst_90 {dimension_numbers = #tpu.dot_dimension_numbers<[1], [0], [0], [1], [0, 0, 1, 1], [], []>} : vector<128x64xbf16>, vector<64x64xbf16>, vector<128x64xf32> -> vector<128x64xf32>
    %97 = arith.addf %91, %96 : vector<128x64xf32>
    %c22 = arith.constant 22 : index
    %c0_91 = arith.constant 0 : index
    %98 = vector.load %arg10[%c22, %c0_91] : memref<160x64xf32, #tpu.memory_space<vmem>>, vector<128x64xf32>
    %99 = arith.truncf %98 : vector<128x64xf32> to vector<128x64xbf16>
    %c6 = arith.constant 6 : index
    %c0_92 = arith.constant 0 : index
    %c0_93 = arith.constant 0 : index
    %100 = vector.load %arg4[%c6, %c0_92, %c0_93] : memref<9x64x64xbf16, #tpu.memory_space<vmem>>, vector<1x64x64xbf16>
    %101 = vector.shape_cast %100 : vector<1x64x64xbf16> to vector<64x64xbf16>
    %cst_94 = arith.constant dense<0.000000e+00> : vector<128x64xf32>
    %102 = tpu.matmul %99, %101, %cst_94 {dimension_numbers = #tpu.dot_dimension_numbers<[1], [0], [0], [1], [0, 0, 1, 1], [], []>} : vector<128x64xbf16>, vector<64x64xbf16>, vector<128x64xf32> -> vector<128x64xf32>
    %103 = arith.addf %97, %102 : vector<128x64xf32>
    %c23 = arith.constant 23 : index
    %c0_95 = arith.constant 0 : index
    %104 = vector.load %arg10[%c23, %c0_95] : memref<160x64xf32, #tpu.memory_space<vmem>>, vector<128x64xf32>
    %105 = arith.truncf %104 : vector<128x64xf32> to vector<128x64xbf16>
    %c7 = arith.constant 7 : index
    %c0_96 = arith.constant 0 : index
    %c0_97 = arith.constant 0 : index
    %106 = vector.load %arg4[%c7, %c0_96, %c0_97] : memref<9x64x64xbf16, #tpu.memory_space<vmem>>, vector<1x64x64xbf16>
    %107 = vector.shape_cast %106 : vector<1x64x64xbf16> to vector<64x64xbf16>
    %cst_98 = arith.constant dense<0.000000e+00> : vector<128x64xf32>
    %108 = tpu.matmul %105, %107, %cst_98 {dimension_numbers = #tpu.dot_dimension_numbers<[1], [0], [0], [1], [0, 0, 1, 1], [], []>} : vector<128x64xbf16>, vector<64x64xbf16>, vector<128x64xf32> -> vector<128x64xf32>
    %109 = arith.addf %103, %108 : vector<128x64xf32>
    %c24 = arith.constant 24 : index
    %c0_99 = arith.constant 0 : index
    %110 = vector.load %arg10[%c24, %c0_99] : memref<160x64xf32, #tpu.memory_space<vmem>>, vector<128x64xf32>
    %111 = arith.truncf %110 : vector<128x64xf32> to vector<128x64xbf16>
    %c8 = arith.constant 8 : index
    %c0_100 = arith.constant 0 : index
    %c0_101 = arith.constant 0 : index
    %112 = vector.load %arg4[%c8, %c0_100, %c0_101] : memref<9x64x64xbf16, #tpu.memory_space<vmem>>, vector<1x64x64xbf16>
    %113 = vector.shape_cast %112 : vector<1x64x64xbf16> to vector<64x64xbf16>
    %cst_102 = arith.constant dense<0.000000e+00> : vector<128x64xf32>
    %114 = tpu.matmul %111, %113, %cst_102 {dimension_numbers = #tpu.dot_dimension_numbers<[1], [0], [0], [1], [0, 0, 1, 1], [], []>} : vector<128x64xbf16>, vector<64x64xbf16>, vector<128x64xf32> -> vector<128x64xf32>
    %115 = arith.addf %109, %114 : vector<128x64xf32>
    %116 = vector.broadcast %6 : vector<1x64xf32> to vector<128x64xf32>
    %117 = arith.addf %115, %116 : vector<128x64xf32>
    %cst_103 = arith.constant 0.000000e+00 : f32
    %118 = vector.broadcast %cst_103 : f32 to vector<128x64xf32>
    %119 = arith.maximumf %117, %118 : vector<128x64xf32>
    %c0_104 = arith.constant 0 : index
    %c0_105 = arith.constant 0 : index
    %120 = vector.load %arg8[%c0_104, %c0_105] : memref<128x64xf32, #tpu.memory_space<vmem>>, vector<128x64xf32>
    tpu.vector_store %arg8[%c0_104, %c0_105], %119 {strides = array<i32>} : memref<128x64xf32, #tpu.memory_space<vmem>>, vector<128x64xf32>,
    return
  }
  func.func @transform_0(%arg0: i32) -> (i32, i32) {
    %c0_i32 = arith.constant 0 : i32
    %c0_i32_0 = arith.constant 0 : i32
    return %arg0, %c0_i32 : i32, i32
  }
  func.func @transform_1(%arg0: i32) -> (i32, i32, i32) {
    %c0_i32 = arith.constant 0 : i32
    %c0_i32_0 = arith.constant 0 : i32
    %c0_i32_1 = arith.constant 0 : i32
    %c0_i32_2 = arith.constant 0 : i32
    return %c0_i32, %c0_i32_0, %c0_i32_1 : i32, i32, i32
  }
  func.func @transform_2(%arg0: i32) -> (i32, i32, i32) {
    %c0_i32 = arith.constant 0 : i32
    %c0_i32_0 = arith.constant 0 : i32
    %c0_i32_1 = arith.constant 0 : i32
    %c0_i32_2 = arith.constant 0 : i32
    return %c0_i32, %c0_i32_0, %c0_i32_1 : i32, i32, i32
  }
  func.func @transform_3(%arg0: i32) -> (i32, i32, i32) {
    %c0_i32 = arith.constant 0 : i32
    %c0_i32_0 = arith.constant 0 : i32
    %c0_i32_1 = arith.constant 0 : i32
    %c0_i32_2 = arith.constant 0 : i32
    return %c0_i32, %c0_i32_0, %c0_i32_1 : i32, i32, i32
  }
  func.func @transform_4(%arg0: i32) -> (i32, i32) {
    %c0_i32 = arith.constant 0 : i32
    %c0_i32_0 = arith.constant 0 : i32
    %c0_i32_1 = arith.constant 0 : i32
    return %c0_i32, %c0_i32_0 : i32, i32
  }
  func.func @transform_5(%arg0: i32) -> (i32, i32) {
    %c0_i32 = arith.constant 0 : i32
    %c0_i32_0 = arith.constant 0 : i32
    %c0_i32_1 = arith.constant 0 : i32
    return %c0_i32, %c0_i32_0 : i32, i32
  }
  func.func @transform_6(%arg0: i32) -> (i32, i32) {
    %c0_i32 = arith.constant 0 : i32
    %c0_i32_0 = arith.constant 0 : i32
    %c0_i32_1 = arith.constant 0 : i32
    return %c0_i32, %c0_i32_0 : i32, i32
  }
  func.func @transform_7(%arg0: i32) -> (i32, i32) {
    %c0_i32 = arith.constant 0 : i32
    %c0_i32_0 = arith.constant 0 : i32
    return %arg0, %c0_i32 : i32, i32
  }
}

</mosaic_0001>

<bundles_post_ra>
// kernel: preprocess_image_forward.1
= control target key start
LH: loop header
LB: loop body
LE: loop exit
PB: predicated region body
PF: predicated region fallthrough
CT: control target
= control target key end

     0   :  { %s6027_s24 = smov 0   ;;  %s7377_s0 = inlined_call_operand.vmem [shape: f32[320,256], index: 0, kind: input, shape index: {}]   ;;  %s7378_s1 = inlined_call_operand.vmem [shape: bf16[4,256,128], index: 1, kind: input, shape index: {}]   ;;  %s7379_s2 = inlined_call_operand.vmem [shape: bf16[4,128,64], index: 2, kind: input, shape index: {}]   ;;  %s7380_s3 = inlined_call_operand.vmem [shape: bf16[9,64,64], index: 3, kind: input, shape index: {}]   ;;  %s7381_s4 = inlined_call_operand.vmem [shape: f32[1,128], index: 4, kind: input, shape index: {}]   ;;  %s7382_s5 = inlined_call_operand.vmem [shape: f32[1,64], index: 5, kind: input, shape index: {}]   ;;  %s7383_s6 = inlined_call_operand.vmem [shape: f32[1,64], index: 6, kind: input, shape index: {}]   ;;  %s7384_s7 = inlined_call_operand.vmem [shape: f32[256,64], index: 7, kind: output, shape index: {}]  }
   0x1 LB: > { %s4454_s25 = sadd.s32 4294967295, %s5984_s24   ;;  %p4458_p0 = scmp.ge.s32.totalorder %s5984_s24, 1  ;;  %s5984_s24 = sphi %s6027_s24, %s17_s24  }
   0x2   : > { %p239_p1 = scmp.lt.s32.totalorder %s5984_s24, 3 }
   0x4   : > { %p240_p2 = pnand %p4458_p0, %p239_p1 }
   0x6   : > { %243 = sbr.rel (%p240_p2) target bundleno = 1272 (0x4f8), region = 48 }
   0xd   : > { %v5846_v0 = vld [vmem:[%s7378_s1 + $0xc0] sm:$0xff]   ;;  %s272_s28 = smul.u32 20, %s4454_s25  ;;  %v5848_v2 = vld [vmem:[%s7378_s1 + $0xc8] sm:$0xff]   ;;  %v5850_v4 = vld [vmem:[%s7378_s1 + $0xd0] sm:$0xff]   ;;  %vm419_vm0 = vsmask.f32 7424 }
   0xe   : > { %v5847_v1 = vld [vmem:[%s7378_s1 + $0x80] sm:$0xff]   ;;  %4881 = vmatprep.subr.bf16.mxu0 %v5846_v0  ;;  %v5849_v3 = vld [vmem:[%s7378_s1 + $0x88] sm:$0xff]   ;;  %v5851_v5 = vld [vmem:[%s7378_s1 + $0x90] sm:$0xff]   ;;  %vm1043_vm1 = vsmask.f32 6400  ;;  %vm1488_vm2 = vcmask 1045504  }
   0xf   : > { %p273_p3 = scmp.lt.s32.totalorder %s272_s28, 39  ;;  %4882 = vmatpush3.bf16.msra.mxu0 %v5847_v1  ;;  %v5852_v6 = vld [vmem:[%s7378_s1 + $0xd8] sm:$0xff]   ;;  %v5854_v8 = vld [vmem:[%s7378_s1 + $0xe0] sm:$0xff]   ;;  %v5856_v10 = vld [vmem:[%s7378_s1 + $0xe8] sm:$0xff]   ;;  %vm290_vm3 = vcmask 523264   ;;  %s4461_s8 = sshll.u32 %s4454_s25, 4 }
  0x10   : > { %4883 = vmatprep.subr.bf16.mxu0 %v5848_v2  ;;  %v5853_v7 = vld [vmem:[%s7378_s1 + $0x98] sm:$0xff]   ;;  %v5855_v9 = vld [vmem:[%s7378_s1 + $0xa0] sm:$0xff]   ;;  %v5857_v21 = vld [vmem:[%s7378_s1 + $0xa8] sm:$0xff]   ;;  %p280_p4 = scmp.lt.s32.totalorder %s4461_s8, 31 }
  0x11   : > { %s7405_s28 = smov (!%p273_p3, %s272_s28), 39  ;;  %v5858_v25 = vld [vmem:[%s7378_s1 + $0xf0] sm:$0xff]   ;;  %v5860_v32 = vld [vmem:[%s7378_s1 + $0xf8] sm:$0xff]   ;;  %v5862_v51 = vld [vmem:[%s7378_s1 + $0x40] sm:$0xff]  }
  0x12   : > { %s4880_s18 = sshll.u32 %s7405_s28, 4  ;;  %v5859_v29 = vld [vmem:[%s7378_s1 + $0xb0] sm:$0xff]   ;;  %v5861_v47 = vld [vmem:[%s7378_s1 + $0xb8] sm:$0xff]   ;;  %v5863_v55 = vld [vmem:[%s7378_s1] sm:$0xff]   ;;  %s7407_s8 = smov (!%p280_p4, %s4461_s8), 31 }
  0x13   : > { %4884 = vmatpush3.bf16.msra.mxu0 %v5849_v3  ;;  %s6067_s27 = scalar_lea.vmem %s7377_s0, %s4880_s18  ;;  %v5864_v62 = vld [vmem:[%s7378_s1 + $0x48] sm:$0xff]   ;;  %s4462_s11 = sshll.u32 %s7407_s8, 3 }
  0x14   : > { %4885 = vmatprep.subr.bf16.mxu0 %v5850_v4  ;;  %v6076_v11 = vld [vmem:[%s6067_s27 + $0x18] sm:$0xff]  ;;  %v6079_v12 = vld [vmem:[%s6067_s27 + $0x28] sm:$0xff]  ;;  %v6090_v16 = vld [vmem:[%s6067_s27 + $0x10] sm:$0xff]  ;;  %s7320_s13 = scalar_lea.vmem %s7384_s7, %s4462_s11 }
  0x15   : > { %v6082_v13 = vld [vmem:[%s6067_s27 + $0x38] sm:$0xff]  ;;  %v379_v15 = vld [vmem:[%s6067_s27 + $0x8] sm:$0xfe]  ;;  %v6093_v17 = vld [vmem:[%s6067_s27 + $0x20] sm:$0xff] }
  0x16   : > { %v6086_v14 = vpack.c.bf16 %v6082_v13, %v6079_v12  ;;  %v383_v18 = vpack.c.bf16 %v6076_v11, %v379_v15  ;;  %v6097_v19 = vld [vmem:[%s6067_s27 + $0x30] sm:$0xff]  ;;  %v378_v20 = vld [vmem:[%s6067_s27] sm:$0xfe]  ;;  %v6113_v28 = vld [vmem:[%s6067_s27 + $0x48] sm:$0xff] }
  0x17   : > { %4886 = vmatpush3.bf16.msra.mxu0 %v5851_v5  ;;  %v6106_v23 = vpack.c.bf16 %v6097_v19, %v6093_v17  ;;  %v382_v24 = vpack.c.bf16 %v6090_v16, %v378_v20  ;;  %v6119_v31 = vld [vmem:[%s6067_s27 + $0x58] sm:$0xff]  ;;  %v6131_v40 = vld [vmem:[%s6067_s27 + $0x40] sm:$0xff]  ;;  %v6135_v43 = vld [vmem:[%s6067_s27 + $0x50] sm:$0xff] }
  0x18   : > { %4887 = vmatprep.subr.bf16.mxu0 %v5852_v6  ;;  %v440_v22 = vshll.u32 %v6086_v14, 16  ;;  %v433_v26 = vshrl.u32 %v383_v18, 16  ;;  %v435_v27 = vshll.u32 %v383_v18, 16  ;;  %v6126_v36 = vpack.c.bf16 %v6119_v31, %v6113_v28  ;;  %v6138_v44 = vld [vmem:[%s6067_s27 + $0x68] sm:$0xff]  ;;  %v6141_v45 = vld [vmem:[%s6067_s27 + $0x78] sm:$0xff]  ;;  %v6163_v57 = vld [vmem:[%s6067_s27 + $0x60] sm:$0xff] }
  0x19   : > { %v423_v30 = vshll.u32 %v382_v24, 16  ;;  %v421_v35 = vshrl.u32 %v382_v24, 16  ;;  %v428_v38 = vshll.u32 %v6106_v23, 16  ;;  %v452_v39 = vshrl.u32 %v6086_v14, 16  ;;  %v6168_v60 = vld [vmem:[%s6067_s27 + $0x70] sm:$0xff]  ;;  %v6177_v1 = vld [vmem:[%s6067_s27 + $0x88] sm:$0xff] }
  0x1a   : > { %v437_v33 = vrot.slane %v435_v27, 1  ;;  %v442_v34 = vrot.slane %v440_v22, 1  ;;  %v456_v42 = vshll.u32 %v6126_v36, 16  ;;  %v6149_v50 = vpack.c.bf16 %v6135_v43, %v6131_v40  ;;  %v6180_v2 = vld [vmem:[%s6067_s27 + $0x98] sm:$0xff]  ;;  %v5865_v3 = vld [vmem:[%s7378_s1 + $0x8] sm:$0xff]   ;;  %v5866_v18 = vld [vmem:[%s7378_s1 + $0x50] sm:$0xff]  }
  0x1b   : > { %4888 = vmatpush3.bf16.msra.mxu0 %v5853_v7  ;;  %v425_v37 = vrot.slane %v423_v30, 1  ;;  %v430_v49 = vrot.slane %v428_v38, 1  ;;  %v6156_v54 = vpack.c.bf16 %v6141_v45, %v6138_v44  ;;  %v444_v56 = vshrl.u32 %v6106_v23, 16  ;;  %v6203_v20 = vld [vmem:[%s6067_s27 + $0xa8] sm:$0xff]  ;;  %v6209_v22 = vld [vmem:[%s6067_s27 + $0xa0] sm:$0xff]  ;;  %v5867_v30 = vld [vmem:[%s7378_s1 + $0x10] sm:$0xff]  }
  0x1c   : > { %4889 = vmatprep.subr.bf16.mxu0 %v5854_v8  ;;  %v438_v41 = vor.u32 %v437_v33, %v433_v26  ;;  %v454_v52 = vor.u32 %v452_v39, %v442_v34  ;;  %v458_v53 = vrot.slane %v456_v42, 1  ;;  %v448_v59 = vshll.u32 %v6149_v50, 16  ;;  %v6194_v8 = vld [vmem:[%s6067_s27 + $0x80] sm:$0xff]  ;;  %v6217_v26 = vld [vmem:[%s6067_s27 + $0xb0] sm:$0xff]  ;;  %v5868_v33 = vld [vmem:[%s7378_s1 + $0x58] sm:$0xff]  }
  0x1d   : > { %v426_v48 = vor.u32 %v425_v37, %v421_v35  ;;  %v468_v63 = vshrl.u32 %v6126_v36, 16  ;;  %v472_v0 = vshll.u32 %v6156_v54, 16  ;;  %v6187_v4 = vpack.c.bf16 %v6168_v60, %v6163_v57  ;;  %v6234_v38 = vld [vmem:[%s6067_s27 + $0xd8] sm:$0xff] }
  0x1e   : > { %v443_v46 = vsel %vm419_vm0, %v438_v41, %v442_v34  ;;  %v459_v61 = vsel %vm419_vm0, %v454_v52, %v458_v53  ;;  %v446_v5 = vor.u32 %v444_v56, %v430_v49  ;;  %v450_v6 = vrot.slane %v448_v59, 1  ;;  %v6229_v34 = vld [vmem:[%s6067_s27 + $0xc8] sm:$0xff]  ;;  %v5870_v59 = vld [vmem:[%s7378_s1 + $0x60] sm:$0xff]  }
  0x1f   : > { %4890 = vmatpush3.bf16.msra.mxu0 %v5855_v9  ;;  %700 = vmatprep.mubr.bf16.mxu0 %v443_v46  ;;  %v431_v58 = vsel %vm419_vm0, %v426_v48, %v430_v49  ;;  %7390 = vst [vmem:[#allocation4_spill] sm:$0xff] %v6187_v4  ;;  %v6191_v7 = vpack.c.bf16 %v6180_v2, %v6177_v1  ;;  %v6197_v9 = vld [vmem:[%s6067_s27 + $0x90] sm:$0xff]  ;;  %v474_v15 = vrot.slane %v472_v0, 1  ;;  %v464_v24 = vshll.u32 %v6187_v4, 16  ;;  %v5871_v0 = vld [vmem:[%s7378_s1 + $0x20] sm:$0xff]  }
  0x20   : > { %4891 = vmatprep.subr.bf16.mxu0 %v5856_v10  ;;  %v470_v10 = vor.u32 %v468_v63, %v458_v53  ;;  %v451_v27 = vsel %vm419_vm0, %v446_v5, %v450_v6  ;;  %v484_v37 = vshrl.u32 %v6156_v54, 16  ;;  %v6242_v41 = vpack.c.bf16 %v6217_v26, %v6209_v22  ;;  %v6254_v53 = vld [vmem:[%s6067_s27 + $0xc0] sm:$0xff] }
  0x21   : > { %7391 = vst [vmem:[#allocation5_spill] sm:$0xff] %v6191_v7  ;;  %v466_v42 = vrot.slane %v464_v24, 1  ;;  %v6251_v52 = vpack.c.bf16 %v6234_v38, %v6229_v34 }
  0x22   : > { %v475_v35 = vsel %vm419_vm0, %v470_v10, %v474_v15  ;;  %7394 = vst [vmem:[#allocation8_spill] sm:$0xff] %v6242_v41  ;;  %v486_v56 = vor.u32 %v484_v37, %v474_v15  ;;  %v496_v63 = vshll.u32 %v6242_v41, 16  ;;  %v5872_v10 = vld [vmem:[%s7378_s1 + $0x68] sm:$0xff]  }
  0x23   : > { %4892 = vmatpush3.bf16.msra.mxu0 %v5857_v21  ;;  %v6206_v21 = vld [vmem:[%s6067_s27 + $0xb8] sm:$0xff]  ;;  %v6278_v15 = vld [vmem:[%s6067_s27 + $0xe8] sm:$0xff] }
  0x24   : > { %4893 = vmatprep.subr.bf16.mxu0 %v5858_v25  ;;  %v6214_v25 = vpack.c.bf16 %v6197_v9, %v6194_v8  ;;  %v6238_v39 = vpack.c.bf16 %v6206_v21, %v6203_v20  ;;  %v6293_v37 = vrot.slane %v496_v63, 1  ;;  %v6312_v63 = vpack.c.bf16 %v6113_v28, %v6082_v13  ;;  %v5876_v28 = vld [vmem:[%s7378_s1 + $0x78] sm:$0xff]  }
  0x26   : > { %7392 = vst [vmem:[#allocation6_spill] sm:$0xff] %v6214_v25  ;;  %7393 = vst [vmem:[#allocation7_spill] sm:$0xff] %v6238_v39  ;;  %v480_v46 = vshll.u32 %v6214_v25, 16  ;;  %v516_v5 = vshrl.u32 %v6238_v39, 16 }
  0x27   : > { %4894 = vmatpush3.bf16.msra.mxu0 %v5859_v29  ;;  %v460_v29 = vshrl.u32 %v6149_v50, 16 }
  0x28   : > { %4895 = vmatprep.subr.bf16.mxu0 %v5860_v32  ;;  %v488_v32 = vshll.u32 %v6191_v7, 16 }
  0x29   : > { %v462_v48 = vor.u32 %v460_v29, %v450_v6 }
  0x2a   : > { %v490_v49 = vrot.slane %v488_v32, 1  ;;  %v6290_v32 = vld [vmem:[%s6067_s27 + $0xf0] sm:$0xff] }
  0x2b   : > { %4896 = vmatpush3.bf16.msra.mxu0 %v5861_v47  ;;  %v5869_v47 = vld [vmem:[%s7378_s1 + $0x18] sm:$0xff]   ;;  %v467_v24 = vsel %vm419_vm0, %v462_v48, %v466_v42  ;;  %v5873_v48 = vld [vmem:[%s7378_s1 + $0x28] sm:$0xff]  }
  0x2c   : > { %4945 = vmatprep.subr.bf16.mxu0 %v5862_v51  ;;  %v476_v51 = vshrl.u32 %v6187_v4, 16 }
  0x2e   : > { %701 = vmatmul.mubr.bf16.vlgmr.msra.gmra.mrb[0].mxu0 %v431_v58  ;;  %v500_v58 = vshrl.u32 %v6191_v7, 16 }
  0x2f   : > { %4946 = vmatpush3.bf16.msra.mxu0 %v5863_v55  ;;  %708 = vmatprep.mubr.bf16.mxu0 %v459_v61  ;;  %v6257_v55 = vld [vmem:[%s6067_s27 + $0xd0] sm:$0xff]  ;;  %v504_v61 = vshll.u32 %v6238_v39, 16  ;;  %v5889_v39 = vld [vmem:[%s7378_s1 + $0x180] sm:$0xff]  }
  0x30   : > { %4947 = vmatprep.subr.bf16.mxu0 %v5864_v62  ;;  %v492_v62 = vshrl.u32 %v6214_v25, 16  ;;  %v6272_v6 = vpack.c.bf16 %v6257_v55, %v6254_v53  ;;  %v5874_v25 = vld [vmem:[%s7378_s1 + $0x70] sm:$0xff]  }
  0x33   : > { %4948 = vmatpush3.bf16.msra.mxu0 %v5865_v3  ;;  %v482_v3 = vrot.slane %v480_v46, 1 }
  0x34   : > { %4949 = vmatprep.subr.bf16.mxu0 %v5866_v18  ;;  %v6281_v18 = vld [vmem:[%s6067_s27 + $0xf8] sm:$0xff] }
  0x35   : > { %v6297_v46 = vpack.c.bf16 %v6281_v18, %v6278_v15 }
  0x36   : > { %709 = vmatmul.mubr.bf16.gmra.mrb[4].mxu0 %v451_v27  ;;  %v520_v27 = vshll.u32 %v6251_v52, 16 }
  0x37   : > { %716 = vmatprep.mubr.bf16.mxu0 %v475_v35  ;;  %4950 = vmatpush3.bf16.msra.mxu0 %v5867_v30  ;;  %v6287_v30 = vld [vmem:[%s6067_s27 + $0xe0] sm:$0xff]  ;;  %v506_v35 = vrot.slane %v504_v61, 1 }
  0x38   : > { %4951 = vmatprep.subr.bf16.mxu0 %v5868_v33  ;;  %v491_v33 = vsel %vm419_vm0, %v486_v56, %v490_v49  ;;  %v6305_v29 = vpack.c.bf16 %v6290_v32, %v6287_v30  ;;  %v478_v56 = vor.u32 %v476_v51, %v466_v42  ;;  %v5875_v42 = vld [vmem:[%s7378_s1 + $0x30] sm:$0xff]  }
  0x3a   : > { %v483_v13 = vsel %vm419_vm0, %v478_v56, %v482_v3  ;;  %v6342_v56 = vpack.c.bf16 %v6131_v40, %v6097_v19  ;;  %v494_v19 = vor.u32 %v492_v62, %v482_v3  ;;  %v380_v3 = vld [vmem:[%s6067_s27 + $0x100] sm:$0x1] }
  0x3b   : > { %4952 = vmatpush3.bf16.msra.mxu0 %v5869_v47  ;;  %v512_v47 = vshll.u32 %v6272_v6, 16 }
  0x3c   : > { %4953 = vmatprep.subr.bf16.mxu0 %v5870_v59  ;;  %v6307_v59 = vrot.slane %v520_v27, 1  ;;  %v1073_v27 = vshll.u32 %v6312_v63, 16 }
  0x3d   : > { %v6322_v51 = vrot.slane %v512_v47, 1 }
  0x3e   : > { %717 = vmatmul.mubr.bf16.gmra.mrb[8].mxu0 %v467_v24  ;;  %v502_v24 = vor.u32 %v500_v58, %v490_v49  ;;  %v1070_v49 = vshrl.u32 %v6312_v63, 16 }
  0x3f   : > { %724 = vmatprep.mubr.bf16.mxu0 %v491_v33  ;;  %4954 = vmatpush3.bf16.msra.mxu0 %v5871_v0  ;;  %v536_v33 = vshll.u32 %v6297_v46, 16  ;;  %v528_v0 = vshll.u32 %v6305_v29, 16 }
  0x40   : > { %4955 = vmatprep.subr.bf16.mxu0 %v5872_v10  ;;  %v507_v58 = vsel %vm419_vm0, %v502_v24, %v506_v35  ;;  %v5887_v10 = vld [vmem:[%s7378_s1 + $0x1c0] sm:$0xff]   ;;  %v1072_v40 = vrot.slane %v1070_v49, 1  ;;  %v1075_v24 = vrot.slane %v1073_v27, 2 }
  0x41   : > { %v6335_v47 = vrot.slane %v536_v33, 1  ;;  %v5878_v33 = vld [vmem:[%s7378_s1 + $0x140] sm:$0xff]   ;;  %5073 = vmatprep.subr.bf16.mxu1 %v5887_v10  ;;  %v5891_v10 = vld [vmem:[%s7378_s1 + $0x188] sm:$0xff]   ;;  %v530_v7 = vrot.slane %v528_v0, 1  ;;  %v7396_v0 = vshrl.u32 %v6251_v52, 16 }
  0x42   : > { %5074 = vmatpush3.bf16.msra.mxu1 %v5889_v39  ;;  %v6371_v39 = vpack.c.bf16 %v6163_v57, %v6135_v43  ;;  %v7395_v43 = vshrl.u32 %v6242_v41, 16 }
  0x43   : > { %4956 = vmatpush3.bf16.msra.mxu0 %v5873_v48  ;;  %v5877_v48 = vld [vmem:[%s7378_s1 + $0x38] sm:$0xff]  }
  0x44   : > { %4957 = vmatprep.subr.bf16.mxu0 %v5874_v25  ;;  %v6346_v25 = vpack.c.bf16 %v6138_v44, %v6119_v31  ;;  %v5890_v31 = vld [vmem:[%s7378_s1 + $0x1c8] sm:$0xff]   ;;  %v518_v44 = vor.u32 %v516_v5, %v506_v35  ;;  %v499_v35 = vsel %vm419_vm0, %v494_v19, %v6293_v37  ;;  %v510_v57 = vor.u32 %v7395_v43, %v6293_v37 }
  0x45   : > { %5075 = vmatprep.subr.bf16.mxu1 %v5890_v31  ;;  %v5895_v31 = vld [vmem:[%s7378_s1 + $0x190] sm:$0xff]   ;;  %v1082_v41 = vshll.u32 %v6371_v39, 16  ;;  %v6393_v37 = vpack.c.bf16 %v6177_v1, %v6141_v45  ;;  %v5899_v45 = vld [vmem:[%s7378_s1 + $0x1e0] sm:$0xff]   ;;  %v6426_v43 = vpack.c.bf16 %v6194_v8, %v6168_v60 }
  0x46   : > { %725 = vmatmul.mubr.bf16.gmra.mrb[12].mxu0 %v483_v13  ;;  %v381_v13 = vld [vmem:[%s6067_s27 + $0x108] sm:$0x1]  ;;  %v1088_v62 = vshrl.u32 %v6346_v25, 16  ;;  %v1091_v5 = vshll.u32 %v6346_v25, 16  ;;  %v523_v27 = vsel %vm419_vm0, %v518_v44, %v6307_v59  ;;  %5076 = vmatpush3.bf16.msra.mxu1 %v5891_v10  ;;  %v6387_v44 = vor.u32 %v1075_v24, %v1072_v40 }
  0x47   : > { %732 = vmatprep.mubr.bf16.mxu0 %v507_v58  ;;  %4958 = vmatpush3.bf16.msra.mxu0 %v5875_v42  ;;  %v1053_v58 = vshrl.u32 %v6342_v56, 16  ;;  %v5893_v42 = vld [vmem:[%s7378_s1 + $0x1d0] sm:$0xff]   ;;  %v385_v19 = vpack.c.bf16 %v381_v13, %v381_v13  ;;  %v534_v13 = vor.u32 %v7396_v0, %v6307_v59  ;;  %v1084_v1 = vrot.slane %v1082_v41, 2  ;;  %v5901_v41 = vld [vmem:[%s7378_s1 + $0x1a0] sm:$0xff]  }
  0x48   : > { %4959 = vmatprep.subr.bf16.mxu0 %v5876_v28  ;;  %v1056_v28 = vshll.u32 %v6342_v56, 16  ;;  %v1090_v49 = vrot.slane %v1088_v62, 1  ;;  %v1093_v61 = vrot.slane %v1091_v5, 2  ;;  %5077 = vmatprep.subr.bf16.mxu1 %v5893_v42  ;;  %v1079_v62 = vshrl.u32 %v6371_v39, 16 }
  0x49   : > { %v384_v5 = vpack.c.bf16 %v380_v3, %v380_v3  ;;  %v515_v59 = vsel %vm419_vm0, %v510_v57, %v6322_v51  ;;  %v540_v3 = vshrl.u32 %v6305_v29, 16 }
  0x4a   : > { %v1094_v10 = vor.u32 %v1093_v61, %v1090_v49  ;;  %v1058_v4 = vrot.slane %v1056_v28, 2  ;;  %5078 = vmatpush3.bf16.msra.mxu1 %v5895_v31  ;;  %v5897_v61 = vld [vmem:[%s7378_s1 + $0x198] sm:$0xff]   ;;  %v1081_v40 = vrot.slane %v1079_v62, 1  ;;  %v1106_v49 = vshrl.u32 %v6393_v37, 16 }
  0x4b   : > { %4960 = vmatpush3.bf16.msra.mxu0 %v5877_v48  ;;  %v5896_v48 = vld [vmem:[%s7378_s1 + $0x1d8] sm:$0xff]   ;;  %v6411_v42 = vshll.u32 %v384_v5, 16  ;;  %v1109_v31 = vshll.u32 %v6393_v37, 16 }
  0x4c   : > { %5009 = vmatprep.subr.bf16.mxu0 %v5878_v33  ;;  %v1055_v33 = vrot.slane %v1053_v58, 1  ;;  %v6403_v24 = vsel %vm1043_vm1, %v6387_v44, %v1094_v10  ;;  %5079 = vmatprep.subr.bf16.mxu1 %v5896_v48  ;;  %v552_v58 = vshll.u32 %v385_v19, 16  ;;  %v6415_v28 = vor.u32 %v1084_v1, %v1081_v40  ;;  %v6432_v19 = vld [vmem:[%s6067_s27 + $0x8] sm:$0xff] }
  0x4d   : > { %v5902_v48 = vld [vmem:[%s7378_s1 + $0x1e8] sm:$0xff]   ;;  %v1108_v62 = vrot.slane %v1106_v49, 1  ;;  %v1111_v8 = vrot.slane %v1109_v31, 2  ;;  %v546_v0 = vrot.slane %v6411_v42, 1  ;;  %v1097_v40 = vshrl.u32 %v6426_v43, 16 }
  0x4e   : > { %733 = vmatmul.mubr.bf16.gmra.mrb[16].mxu0 %v499_v35  ;;  %v6413_v35 = vor.u32 %v1058_v4, %v1055_v33  ;;  %5080 = vmatpush3.bf16.msra.mxu1 %v5897_v61  ;;  %v7397_v4 = vshrl.u32 %v6272_v6, 16  ;;  %v554_v60 = vrot.slane %v552_v58, 1  ;;  %v542_v1 = vor.u32 %v540_v3, %v530_v7  ;;  %v959_v49 = vld [vmem:[%s6067_s27 + $0x18] sm:$0xf8] }
  0x4f   : > { %740 = vmatprep.mubr.bf16.mxu0 %v523_v27  ;;  %v539_v27 = vsel %vm419_vm0, %v534_v13, %v6335_v47  ;;  %5081 = vmatprep.subr.bf16.mxu1 %v5899_v45  ;;  %v5903_v13 = vld [vmem:[%s7378_s1 + $0x1a8] sm:$0xff]   ;;  %v6449_v61 = vor.u32 %v1111_v8, %v1108_v62  ;;  %v6459_v58 = vpack.c.bf16 %v6203_v20, %v6180_v2  ;;  %v1099_v3 = vrot.slane %v1097_v40, 1 }
  0x50   : > { %v526_v57 = vor.u32 %v7397_v4, %v6322_v51  ;;  %v6440_v33 = vsel %vm1043_vm1, %v6413_v35, %v6415_v28  ;;  %v7398_v51 = vshrl.u32 %v6297_v46, 16  ;;  %v331_v42 = vpack.c.bf16 %v6076_v11, %v6432_v19  ;;  %v1430_v4 = vld [vmem:[%s6067_s27 + $0x18] sm:$0xf0]  ;;  %v5879_v19 = vld [vmem:[%s7378_s1 + $0x100] sm:$0xff]  }
  0x51   : > { %v993_v31 = vpack.c.bf16 %v6079_v12, %v959_v49  ;;  %v6476_v2 = vpack.c.bf16 %v6209_v22, %v6197_v9  ;;  %v6480_v20 = vpack.c.bf16 %v6229_v34, %v6206_v21  ;;  %v5908_v9 = vld [vmem:[%s7378_s1 + $0x1f8] sm:$0xff]   ;;  %v1490_v34 = vrot.slane %v6342_v56, 2 }
  0x52   : > { %v550_v5 = vor.u32 %v7398_v51, %v6335_v47  ;;  %5082 = vmatpush3.bf16.msra.mxu1 %v5901_v41  ;;  %v531_v45 = vsel %vm419_vm0, %v526_v57, %v530_v7  ;;  %v5905_v47 = vld [vmem:[%s7378_s1 + $0x1f0] sm:$0xff]   ;;  %v6467_v7 = vsel %vm1043_vm1, %v1094_v10, %v6449_v61  ;;  %v1434_v10 = vpack.c.bf16 %v6079_v12, %v1430_v4  ;;  %v1432_v56 = vld [vmem:[%s6067_s27 + $0x118] sm:$0xf] }
  0x53   : > { %5083 = vmatprep.subr.bf16.mxu1 %v5902_v48  ;;  %v958_v57 = vld [vmem:[%s6067_s27 + $0x10] sm:$0xf8]  ;;  %v1062_v22 = vshrl.u32 %v993_v31, 16  ;;  %v1065_v21 = vshll.u32 %v993_v31, 16  ;;  %v1124_v51 = vshrl.u32 %v6459_v58, 16  ;;  %v1497_v40 = vrot.slane %v6346_v25, 2 }
  0x54   : > { %v555_v41 = vsel %vm419_vm0, %v550_v5, %v554_v60  ;;  %v1429_v48 = vld [vmem:[%s6067_s27 + $0x10] sm:$0xf0]  ;;  %v992_v62 = vpack.c.bf16 %v6093_v17, %v958_v57  ;;  %v1492_v5 = vrot.slane %v1434_v10, 2  ;;  %v547_v31 = vsel %vm419_vm0, %v542_v1, %v546_v0 }
  0x55   : > { %v1433_v60 = vpack.c.bf16 %v6093_v17, %v1429_v48  ;;  %v5909_v17 = vld [vmem:[%s7378_s1 + $0x1b8] sm:$0xff]   ;;  %v1118_v0 = vshll.u32 %v6476_v2, 16  ;;  %v6508_v1 = vpack.c.bf16 %v6254_v53, %v6217_v26 }
  0x56   : > { %741 = vmatmul.mubr.bf16.gmra.mrb[20].mxu0 %v515_v59  ;;  %v1100_v59 = vshll.u32 %v6426_v43, 16  ;;  %5084 = vmatpush3.bf16.msra.mxu1 %v5903_v13  ;;  %v1045_v13 = vshrl.u32 %v992_v62, 16  ;;  %v1048_v12 = vshll.u32 %v992_v62, 16  ;;  %v1126_v62 = vrot.slane %v1124_v51, 1 }
  0x57   : > { %748 = vmatprep.mubr.bf16.mxu0 %v539_v27  ;;  %v1493_v27 = vrot.slane %v6312_v63, 2  ;;  %v5907_v63 = vld [vmem:[%s7378_s1 + $0x1b0] sm:$0xff]   ;;  %5085 = vmatprep.subr.bf16.mxu1 %v5905_v47  ;;  %v1064_v47 = vrot.slane %v1062_v22, 1  ;;  %v1489_v49 = vrot.slane %v1433_v60, 2  ;;  %v1127_v22 = vshll.u32 %v6459_v58, 16 }
  0x58   : > { %v1102_v8 = vrot.slane %v1100_v59, 2  ;;  %v1067_v59 = vrot.slane %v1065_v21, 2  ;;  %v1050_v48 = vrot.slane %v1048_v12, 2  ;;  %v1120_v51 = vrot.slane %v1118_v0, 2 }
  0x59   : > { %v1494_v57 = vsel %vm1488_vm2, %v1492_v5, %v1493_v27  ;;  %v1129_v60 = vrot.slane %v1127_v22, 2  ;;  %v1491_v26 = vsel %vm1488_vm2, %v1489_v49, %v1490_v34 }
  0x5a   : > { %v1103_v4 = vor.u32 %v1102_v8, %v1099_v3  ;;  %5086 = vmatpush3.bf16.msra.mxu1 %v5907_v63  ;;  %v1068_v10 = vor.u32 %v1067_v59, %v1064_v47  ;;  %1667 = vmatprep.mubr.bf16.mxu1 %v1494_v57  ;;  %v1115_v3 = vshrl.u32 %v6476_v2, 16  ;;  %v6517_v8 = vpack.c.bf16 %v6278_v15, %v6234_v38  ;;  %v298_v15 = vld [vmem:[%s6067_s27] sm:$0xff]  ;;  %v989_v57 = vld [vmem:[%s6067_s27 + $0x108] sm:$0xff] }
  0x5b   : > { %5087 = vmatprep.subr.bf16.mxu1 %v5908_v9  ;;  %v1130_v5 = vor.u32 %v1129_v60, %v1126_v62  ;;  %v1145_v38 = vshll.u32 %v6480_v20, 16  ;;  %v6535_v47 = vpack.c.bf16 %v6287_v30, %v6257_v55  ;;  %v330_v11 = vpack.c.bf16 %v6090_v16, %v298_v15  ;;  %v988_v60 = vld [vmem:[%s6067_s27 + $0x100] sm:$0xff] }
  0x5c   : > { %v6512_v63 = vsel %vm1043_vm1, %v1068_v10, %v6387_v44  ;;  %v1117_v53 = vrot.slane %v1115_v3, 1  ;;  %v1498_v44 = vsel %vm1488_vm2, %v1493_v27, %v1497_v40  ;;  %v1495_v27 = vrot.slane %v6371_v39, 2  ;;  %v5880_v10 = vld [vmem:[%s7378_s1 + $0x148] sm:$0xff]  }
  0x5d   : > { %v6543_v59 = vsel %vm1043_vm1, %v6449_v61, %v1130_v5  ;;  %v1147_v49 = vrot.slane %v1145_v38, 2  ;;  %v1151_v22 = vshrl.u32 %v6535_v47, 16  ;;  %v6565_v0 = vpack.c.bf16 %v989_v57, %v6281_v18  ;;  %v5884_v57 = vld [vmem:[%s7378_s1 + $0x158] sm:$0xff]  }
  0x5e   : > { %749 = vmatmul.mubr.bf16.gmra.mrb[24].mxu0 %v531_v45  ;;  %v1047_v45 = vrot.slane %v1045_v13, 1  ;;  %5088 = vmatpush3.bf16.msra.mxu1 %v5909_v17  ;;  %v1121_v12 = vor.u32 %v1120_v51, %v1117_v53  ;;  %v1136_v17 = vshll.u32 %v6508_v1, 16  ;;  %v1496_v51 = vsel %vm1488_vm2, %v1490_v34, %v1495_v27 }
  0x5f   : > { %756 = vmatprep.mubr.bf16.mxu0 %v555_v41  ;;  %v6501_v41 = vsel %vm1043_vm1, %v6415_v28, %v1103_v4  ;;  %v1142_v28 = vshrl.u32 %v6480_v20, 16  ;;  %v1178_v18 = vshrl.u32 %v6565_v0, 16 }
  0x60   : > { %v1051_v21 = vor.u32 %v1050_v48, %v1047_v45  ;;  %v6548_v45 = vsel %vm1043_vm1, %v1103_v4, %v1121_v12  ;;  %v1138_v30 = vrot.slane %v1136_v17, 2  ;;  %v1163_v48 = vshll.u32 %v6517_v8, 16 }
  0x61   : > { %v1144_v13 = vrot.slane %v1142_v28, 1  ;;  %1668 = vmatmul.mubr.bf16.vlgmr.msra.gmra.mrb[0].mxu1 %v1491_v26  ;;  %v1501_v4 = vrot.slane %v6393_v37, 2  ;;  %v1153_v26 = vrot.slane %v1151_v22, 1  ;;  %v5881_v37 = vld [vmem:[%s7378_s1 + $0x108] sm:$0xff]   ;;  %v1517_v22 = vrot.slane %v6565_v0, 2 }
  0x62   : > { %v6521_v9 = vsel %vm1043_vm1, %v1051_v21, %v6413_v35  ;;  %v1133_v35 = vshrl.u32 %v6508_v1, 16  ;;  %1675 = vmatprep.mubr.bf16.mxu1 %v1498_v44  ;;  %v1154_v21 = vshll.u32 %v6535_v47, 16  ;;  %v1165_v3 = vrot.slane %v1163_v48, 2 }
  0x63   : > { %v1502_v38 = vsel %vm1488_vm2, %v1497_v40, %v1501_v4  ;;  %v1507_v48 = vrot.slane %v6508_v1, 2 }
  0x64   : > { %v1135_v55 = vrot.slane %v1133_v35, 1  ;;  %v1156_v53 = vrot.slane %v1154_v21, 2  ;;  %v1180_v35 = vrot.slane %v1178_v18, 1  ;;  %v7401_v18 = vld [vmem:[#allocation6_spill] sm:$0xff] }
  0x66   : > { %757 = vmatmul.mubr.bf16.gmra.mrb[28].mxu0 %v547_v31  ;;  %v1160_v31 = vshrl.u32 %v6517_v8, 16  ;;  %v1139_v62 = vor.u32 %v1138_v30, %v1135_v55  ;;  %v1157_v15 = vor.u32 %v1156_v53, %v1153_v26  ;;  %v1505_v55 = vrot.slane %v6459_v58, 2  ;;  %v5885_v58 = vld [vmem:[%s7378_s1 + $0x118] sm:$0xff]   ;;  %v7399_v53 = vld [vmem:[#allocation4_spill] sm:$0xff] }
  0x67   : > { %893 = vmatprep.mubr.bf16.mxu0 %v331_v42  ;;  %v1148_v42 = vor.u32 %v1147_v49, %v1144_v13  ;;  %v5882_v13 = vld [vmem:[%s7378_s1 + $0x150] sm:$0xff]   ;;  %v5906_v26 = vld [vmem:[%s7378_s1 + $0x138] sm:$0xff]  }
  0x68   : > { %v1162_v61 = vrot.slane %v1160_v31, 1  ;;  %v6569_v28 = vsel %vm1043_vm1, %v1121_v12, %v1139_v62  ;;  %v6588_v12 = vpack.c.bf16 %v988_v60, %v6290_v32  ;;  %v6596_v49 = vsel %vm1043_vm1, %v1139_v62, %v1157_v15  ;;  %v5883_v32 = vld [vmem:[%s7378_s1 + $0x110] sm:$0xff]  }
  0x69   : > { %v6562_v16 = vsel %vm1043_vm1, %v1130_v5, %v1148_v42  ;;  %v1181_v5 = vshll.u32 %v6565_v0, 16  ;;  %1676 = vmatmul.mubr.bf16.gmra.mrb[4].mxu1 %v1496_v51  ;;  %v1506_v1 = vsel %vm1488_vm2, %v1501_v4, %v1505_v55  ;;  %v5900_v60 = vld [vmem:[%s7378_s1 + $0x130] sm:$0xff]   ;;  %v7400_v51 = vld [vmem:[#allocation5_spill] sm:$0xff] }
  0x6a   : > { %v1166_v44 = vor.u32 %v1165_v3, %v1162_v61  ;;  %v1169_v25 = vshrl.u32 %v6588_v12, 16  ;;  %v1172_v40 = vshll.u32 %v6588_v12, 16  ;;  %1683 = vmatprep.mubr.bf16.mxu1 %v1502_v38  ;;  %v1515_v39 = vrot.slane %v6588_v12, 2  ;;  %v5898_v3 = vld [vmem:[%s7378_s1 + $0x170] sm:$0xff]  }
  0x6b   : > { %v1183_v17 = vrot.slane %v1181_v5, 2  ;;  %v1431_v38 = vld [vmem:[%s6067_s27 + $0x110] sm:$0xf] }
  0x6c   : > { %v6593_v34 = vsel %vm1043_vm1, %v1148_v42, %v1166_v44  ;;  %v1171_v30 = vrot.slane %v1169_v25, 1  ;;  %v1509_v42 = vrot.slane %v6480_v20, 2  ;;  %v5886_v20 = vld [vmem:[%s7378_s1 + $0x160] sm:$0xff]   ;;  %v1435_v12 = vpack.c.bf16 %v1431_v38, %v1431_v38 }
  0x6d   : > { %v6604_v31 = vor.u32 %v1183_v17, %v1180_v35 }
  0x6e   : > { %894 = vmatmul.mubr.bf16.vlgmr.msra.gmra.mrb[32].mxu0 %v330_v11  ;;  %v1174_v11 = vrot.slane %v1172_v40, 2  ;;  %v1510_v0 = vsel %vm1488_vm2, %v1505_v55, %v1509_v42  ;;  %v1519_v17 = vrot.slane %v1435_v12, 2 }
  0x6f   : > { %5010 = vmatpush3.bf16.msra.mxu0 %v5879_v19  ;;  %901 = vmatprep.mubr.bf16.mxu0 %v6086_v14  ;;  %v1499_v14 = vrot.slane %v6426_v43, 2  ;;  %v1503_v19 = vrot.slane %v6476_v2, 2  ;;  %v6614_v61 = vsel %vm1043_vm1, %v1166_v44, %v6604_v31  ;;  %v1436_v43 = vpack.c.bf16 %v1432_v56, %v1432_v56  ;;  %v7403_v56 = vld [vmem:[#allocation8_spill] sm:$0xff] }
  0x70   : > { %5011 = vmatprep.subr.bf16.mxu0 %v5880_v10  ;;  %v1513_v10 = vrot.slane %v6517_v8, 2  ;;  %v6618_v62 = vor.u32 %v1174_v11, %v1171_v30  ;;  %v1511_v8 = vrot.slane %v6535_v47, 2  ;;  %v5892_v47 = vld [vmem:[%s7378_s1 + $0x168] sm:$0xff]   ;;  %v1520_v25 = vsel %vm1488_vm2, %v1515_v39, %v1519_v17 }
  0x71   : > { %v1500_v2 = vsel %vm1488_vm2, %v1495_v27, %v1499_v14  ;;  %v5888_v27 = vld [vmem:[%s7378_s1 + $0x120] sm:$0xff]   ;;  %v1504_v4 = vsel %vm1488_vm2, %v1499_v14, %v1503_v19  ;;  %v5911_v14 = vld [vmem:[%s7379_s2 + $0x48] sm:$0xff]  }
  0x72   : > { %v6635_v21 = vsel %vm1043_vm1, %v1157_v15, %v6618_v62  ;;  %1684 = vmatmul.mubr.bf16.gmra.mrb[8].mxu1 %v1500_v2  ;;  %v1512_v44 = vsel %vm1488_vm2, %v1507_v48, %v1511_v8  ;;  %v1518_v5 = vsel %vm1488_vm2, %v1513_v10, %v1517_v22  ;;  %v1516_v15 = vsel %vm1488_vm2, %v1511_v8, %v1515_v39  ;;  %v5913_v2 = vld [vmem:[%s7379_s2 + $0x58] sm:$0xff]   ;;  %v5914_v39 = vld [vmem:[%s7379_s2 + $0x60] sm:$0xff]  }
  0x73   : > { %5012 = vmatpush3.bf16.msra.mxu0 %v5881_v37  ;;  %1691 = vmatprep.mubr.bf16.mxu1 %v1506_v1  ;;  %v1514_v37 = vsel %vm1488_vm2, %v1509_v42, %v1513_v10 }
  0x74   : > { %5013 = vmatprep.subr.bf16.mxu0 %v5882_v13  ;;  %v7402_v13 = vld [vmem:[#allocation7_spill] sm:$0xff] }
  0x76   : > { %902 = vmatmul.mubr.bf16.gmra.mrb[36].mxu0 %v6106_v23  ;;  %v1521_v23 = vrot.slane %v1436_v43, 2 }
  0x77   : > { %909 = vmatprep.mubr.bf16.mxu0 %v6126_v36  ;;  %5014 = vmatpush3.bf16.msra.mxu0 %v5883_v32  ;;  %v5894_v36 = vld [vmem:[%s7378_s1 + $0x128] sm:$0xff]  }
  0x78   : > { %5015 = vmatprep.subr.bf16.mxu0 %v5884_v57  ;;  %v1522_v35 = vsel %vm1488_vm2, %v1517_v22, %v1521_v23 }
  0x7a   : > { %1692 = vmatmul.mubr.bf16.gmra.mrb[12].mxu1 %v1504_v4 }
  0x7b   : > { %5016 = vmatpush3.bf16.msra.mxu0 %v5885_v58  ;;  %1699 = vmatprep.mubr.bf16.mxu1 %v1510_v0 }
  0x7c   : > { %5017 = vmatprep.subr.bf16.mxu0 %v5886_v20 }
  0x7e   : > { %910 = vmatmul.mubr.bf16.gmra.mrb[40].mxu0 %v6149_v50  ;;  %v5904_v50 = vld [vmem:[%s7378_s1 + $0x178] sm:$0xff]  }
  0x7f   : > { %917 = vmatprep.mubr.bf16.mxu0 %v6156_v54  ;;  %5018 = vmatpush3.bf16.msra.mxu0 %v5888_v27  ;;  %v1508_v54 = vsel %vm1488_vm2, %v1503_v19, %v1507_v48  ;;  %v5915_v27 = vld [vmem:[%s7379_s2 + $0x68] sm:$0xff]  }
  0x80   : > { %5019 = vmatprep.subr.bf16.mxu0 %v5892_v47 }
  0x82   : > { %1700 = vmatmul.mubr.bf16.gmra.mrb[16].mxu1 %v1508_v54 }
  0x83   : > { %5020 = vmatpush3.bf16.msra.mxu0 %v5894_v36  ;;  %1707 = vmatprep.mubr.bf16.mxu1 %v1514_v37 }
  0x84   : > { %5021 = vmatprep.subr.bf16.mxu0 %v5898_v3 }
  0x86   : > { %918 = vmatmul.mubr.bf16.gmra.mrb[44].mxu0 %v7399_v53 }
  0x87   : > { %925 = vmatprep.mubr.bf16.mxu0 %v7400_v51  ;;  %5022 = vmatpush3.bf16.msra.mxu0 %v5900_v60  ;;  %v5916_v60 = vld [vmem:[%s7379_s2 + $0x70] sm:$0xff]  }
  0x88   : > { %5023 = vmatprep.subr.bf16.mxu0 %v5904_v50 }
  0x8a   : > { %1708 = vmatmul.mubr.bf16.gmra.mrb[20].mxu1 %v1512_v44 }
  0x8b   : > { %5024 = vmatpush3.bf16.msra.mxu0 %v5906_v26  ;;  %1715 = vmatprep.mubr.bf16.mxu1 %v1518_v5  ;;  %v5917_v26 = vld [vmem:[%s7379_s2 + $0x78] sm:$0xff]  }
  0x8e   : > { %926 = vmatmul.mubr.bf16.gmra.mrb[48].mxu0 %v7401_v18 }
  0x8f   : > { %933 = vmatprep.mubr.bf16.mxu0 %v7402_v13 }
  0x92   : > { %1716 = vmatmul.mubr.bf16.gmra.mrb[24].mxu1 %v1516_v15 }
  0x93   : > { %1723 = vmatprep.mubr.bf16.mxu1 %v1522_v35 }
  0x96   : > { %934 = vmatmul.mubr.bf16.gmra.mrb[52].mxu0 %v7403_v56 }
  0x97   : > { %941 = vmatprep.mubr.bf16.mxu0 %v6251_v52  ;;  %v991_v52 = vld [vmem:[%s6067_s27 + $0x118] sm:$0x7] }
  0x9a   : > { %1724 = vmatmul.mubr.bf16.gmra.mrb[28].mxu1 %v1520_v25 }
  0x9e   : > { %942 = vmatmul.mubr.bf16.gmra.mrb[56].mxu0 %v6272_v6  ;;  %v1009_v6 = vpack.c.bf16 %v991_v52, %v991_v52 }
  0x9f   : > { %949 = vmatprep.mubr.bf16.mxu0 %v6297_v46 }
  0xa0   : > { %v1199_v46 = vshll.u32 %v1009_v6, 16 }
  0xa6   : > { %950 = vmatmul.mubr.bf16.gmra.mrb[60].mxu0 %v6305_v29  ;;  %v1196_v29 = vshrl.u32 %v1009_v6, 16 }
  0xa7   : > { %1348 = vmatprep.mubr.bf16.mxu0 %v6512_v63 }
  0xa8   : > { %v1198_v63 = vrot.slane %v1196_v29, 1  ;;  %v6756_v29 = vld [vmem:[%s7379_s2] sm:$0xff]  }
  0xae   : > { %1349 = vmatmul.mubr.bf16.vlgmr.msra.gmra.mrb[64].mxu0 %v6521_v9 }
  0xaf   : > { %1356 = vmatprep.mubr.bf16.mxu0 %v6403_v24  ;;  %v990_v24 = vld [vmem:[%s6067_s27 + $0x110] sm:$0x7] }
  0xb6   : > { %1357 = vmatmul.mubr.bf16.gmra.mrb[68].mxu0 %v6440_v33  ;;  %v1008_v33 = vpack.c.bf16 %v990_v24, %v990_v24 }
  0xb7   : > { %1364 = vmatprep.mubr.bf16.mxu0 %v6467_v7  ;;  %v1201_v7 = vrot.slane %v1199_v46, 2 }
  0xb8   : > { %v1190_v9 = vshll.u32 %v1008_v33, 16 }
  0xbe   : > { %1365 = vmatmul.mubr.bf16.gmra.mrb[72].mxu0 %v6501_v41  ;;  %v1187_v41 = vshrl.u32 %v1008_v33, 16 }
  0xbf   : > { %1372 = vmatprep.mubr.bf16.mxu0 %v6543_v59  ;;  %v1202_v59 = vor.u32 %v1201_v7, %v1198_v63 }
  0xc6   : > { %1373 = vmatmul.mubr.bf16.gmra.mrb[76].mxu0 %v6548_v45  ;;  %v1189_v45 = vrot.slane %v1187_v41, 1 }
  0xc7   : > { %1380 = vmatprep.mubr.bf16.mxu0 %v6562_v16  ;;  %v1192_v16 = vrot.slane %v1190_v9, 2 }
  0xce   : > { %1381 = vmatmul.mubr.bf16.gmra.mrb[80].mxu0 %v6569_v28  ;;  %v1203_v28 = vsel %vm1043_vm1, %v6604_v31, %v1202_v59 }
  0xcf   : > { %1388 = vmatprep.mubr.bf16.mxu0 %v6593_v34  ;;  %v1193_v34 = vor.u32 %v1192_v16, %v1189_v45 }
  0xd1   : > { %v1194_v40 = vsel %vm1043_vm1, %v6618_v62, %v1193_v34  ;;  %v5912_v62 = vld [vmem:[%s7379_s2 + $0x50] sm:$0xff]  }
  0xd6   : > { %1389 = vmatmul.mubr.bf16.gmra.mrb[84].mxu0 %v6596_v49  ;;  %v5910_v49 = vld [vmem:[%s7379_s2 + $0x40] sm:$0xff]  }
  0xd7   : > { %1396 = vmatprep.mubr.bf16.mxu0 %v6614_v61  ;;  %5309 = vmatprep.subr.bf16.mxu0 %v5910_v49 }
  0xd8   : > { %5310 = vmatpush3.bf16.msra.mxu0 %v5910_v49 }
  0xd9   : > { %5311 = vmatprep.subr.bf16.mxu0 %v5911_v14 }
  0xdc   : > { %5312 = vmatpush3.bf16.msra.mxu0 %v5911_v14 }
  0xdd   : > { %5313 = vmatprep.subr.bf16.mxu0 %v5912_v62 }
  0xde   : > { %1397 = vmatmul.mubr.bf16.gmra.mrb[88].mxu0 %v6635_v21 }
  0xdf   : > { %1404 = vmatprep.mubr.bf16.mxu0 %v1203_v28 }
  0xe0   : > { %5314 = vmatpush3.bf16.msra.mxu0 %v5912_v62 }
  0xe1   : > { %5315 = vmatprep.subr.bf16.mxu0 %v5913_v2 }
  0xe4   : > { %5316 = vmatpush3.bf16.msra.mxu0 %v5913_v2 }
  0xe5   : > { %5317 = vmatprep.subr.bf16.mxu0 %v5914_v39 }
  0xe6   : > { %1405 = vmatmul.mubr.bf16.gmra.mrb[92].mxu0 %v1194_v40 }
  0xe8   : > { %5318 = vmatpush3.bf16.msra.mxu0 %v5914_v39 }
  0xe9   : > { %5319 = vmatprep.subr.bf16.mxu0 %v5915_v27 }
  0xec   : > { %5320 = vmatpush3.bf16.msra.mxu0 %v5915_v27 }
  0xed   : > { %5321 = vmatprep.subr.bf16.mxu0 %v5916_v60 }
  0xf0   : > { %5322 = vmatpush3.bf16.msra.mxu0 %v5916_v60 }
  0xf1   : > { %5323 = vmatprep.subr.bf16.mxu0 %v5917_v26 }
  0xf4   : > { %5324 = vmatpush3.bf16.msra.mxu0 %v5917_v26 }
  0xf5   : > { %5341 = vmatprep.subr.bf16.mxu0 %v6756_v29 }
 0x101   : > { %v4897_v32 = vpop.f32.mrb[0].mxu0 }
 0x102   : > { %v4898_v31 = vpop.f32.mrb[1].mxu0 }
 0x103   : > { %v6707_v57 = vadd.f32 %v4898_v31, %v4897_v32  ;;  %v4900_v55 = vpop.f32.mrb[2].mxu0 }
 0x104   : > { %v4901_v30 = vpop.f32.mrb[3].mxu0 }
 0x105   : > { %v6709_v11 = vadd.f32 %v4901_v30, %v4900_v55 }
 0x109   : > { %v4903_v19 = vpop.f32.mrb[4].mxu0 }
 0x10a   : > { %v4904_v42 = vpop.f32.mrb[5].mxu0 }
 0x10b   : > { %v6711_v61 = vadd.f32 %v4904_v42, %v4903_v19  ;;  %v4906_v43 = vpop.f32.mrb[6].mxu0 }
 0x10c   : > { %v4907_v48 = vpop.f32.mrb[7].mxu0 }
 0x10d   : > { %v6713_v10 = vadd.f32 %v4907_v48, %v4906_v43 }
 0x111   : > { %v4909_v58 = vpop.f32.mrb[8].mxu0 }
 0x112   : > { %v4910_v20 = vpop.f32.mrb[9].mxu0 }
 0x113   : > { %v6721_v1 = vadd.f32 %v4910_v20, %v4909_v58  ;;  %v4912_v8 = vpop.f32.mrb[10].mxu0  ;;  %v5986_v20 = vmov 0.0  }
 0x114   : > { %v4913_v22 = vpop.f32.mrb[11].mxu0  ;;  %286 = vst [vmem:[#allocation2 + $0x80] sm:$0xff] %v5986_v20  ;;  %287 = vst [vmem:[#allocation2 + $0x88] sm:$0xff] %v5986_v20 }
 0x115   : > { %v6723_v21 = vadd.f32 %v4913_v22, %v4912_v8  ;;  %291 = vst.msk [vmem:[#allocation3 + $0x80] sm:$0xff] %vm290_vm3, %v5986_v20  ;;  %292 = vst.msk [vmem:[#allocation3 + $0x88] sm:$0xff] %vm290_vm3, %v5986_v20 }
 0x116   : > { %293 = vst.msk [vmem:[#allocation3 + $0x90] sm:$0xff] %vm290_vm3, %v5986_v20 }
 0x119   : > { %v4915_v23 = vpop.f32.mrb[12].mxu0 }
 0x11a   : > { %v4916_v47 = vpop.f32.mrb[13].mxu0 }
 0x11b   : > { %v6731_v36 = vadd.f32 %v4916_v47, %v4915_v23  ;;  %v4918_v4 = vpop.f32.mrb[14].mxu0 }
 0x11c   : > { %v4919_v3 = vpop.f32.mrb[15].mxu0 }
 0x11d   : > { %v6733_v0 = vadd.f32 %v4919_v3, %v4918_v4 }
 0x121   : > { %v4921_v50 = vpop.f32.mrb[16].mxu0 }
 0x122   : > { %v4922_v54 = vpop.f32.mrb[17].mxu0 }
 0x123   : > { %v6741_v53 = vadd.f32 %v4922_v54, %v4921_v50  ;;  %v4924_v37 = vpop.f32.mrb[18].mxu0 }
 0x124   : > { %v4925_v51 = vpop.f32.mrb[19].mxu0 }
 0x125   : > { %v6743_v44 = vadd.f32 %v4925_v51, %v4924_v37 }
 0x129   : > { %v4927_v18 = vpop.f32.mrb[20].mxu0 }
 0x12a   : > { %v4928_v5 = vpop.f32.mrb[21].mxu0 }
 0x12b   : > { %v6745_v13 = vadd.f32 %v4928_v5, %v4927_v18  ;;  %v4930_v38 = vpop.f32.mrb[22].mxu0 }
 0x12c   : > { %v4931_v15 = vpop.f32.mrb[23].mxu0 }
 0x12d   : > { %v6747_v12 = vadd.f32 %v4931_v15, %v4930_v38 }
 0x131   : > { %v4933_v56 = vpop.f32.mrb[24].mxu0 }
 0x132   : > { %v4934_v35 = vpop.f32.mrb[25].mxu0 }
 0x133   : > { %v6749_v17 = vadd.f32 %v4934_v35, %v4933_v56  ;;  %v4936_v25 = vpop.f32.mrb[26].mxu0 }
 0x134   : > { %v4937_v52 = vpop.f32.mrb[27].mxu0  ;;  %v5089_v33 = vpop.f32.mrb[0].mxu1 }
 0x135   : > { %v6751_v6 = vadd.f32 %v4937_v52, %v4936_v25  ;;  %v5090_v41 = vpop.f32.mrb[1].mxu1 }
 0x136   : > { %v6761_v59 = vadd.f32 %v5090_v41, %v5089_v33  ;;  %v5092_v45 = vpop.f32.mrb[2].mxu1 }
 0x137   : > { %v5093_v28 = vpop.f32.mrb[3].mxu1 }
 0x138   : > { %v6765_v34 = vadd.f32 %v5093_v28, %v5092_v45 }
 0x139   : > { %v4939_v46 = vpop.f32.mrb[28].mxu0 }
 0x13a   : > { %v4940_v24 = vpop.f32.mrb[29].mxu0 }
 0x13b   : > { %v6759_v63 = vadd.f32 %v4940_v24, %v4939_v46  ;;  %v4942_v7 = vpop.f32.mrb[30].mxu0 }
 0x13c   : > { %v4943_v9 = vpop.f32.mrb[31].mxu0  ;;  %v5095_v31 = vpop.f32.mrb[4].mxu1 }
 0x13d   : > { %v6763_v16 = vadd.f32 %v4943_v9, %v4942_v7  ;;  %v5096_v30 = vpop.f32.mrb[5].mxu1 }
 0x13e   : > { %v6770_v43 = vadd.f32 %v5096_v30, %v5095_v31  ;;  %v5098_v48 = vpop.f32.mrb[6].mxu1 }
 0x13f   : > { %v5099_v62 = vpop.f32.mrb[7].mxu1 }
 0x140   : > { %v6775_v2 = vadd.f32 %v5099_v62, %v5098_v48 }
 0x141   : > { %v4961_v40 = vpop.f32.mrb[32].mxu0 }
 0x142   : > { %v4962_v49 = vpop.f32.mrb[33].mxu0 }
 0x143   : > { %v4963_v32 = vadd.f32 %v4962_v49, %v4961_v40  ;;  %v4964_v14 = vpop.f32.mrb[34].mxu0 }
 0x144   : > { %v4965_v55 = vpop.f32.mrb[35].mxu0 }
 0x145   : > { %v6768_v19 = vadd.f32 %v4963_v32, %v6707_v57  ;;  %v4966_v42 = vadd.f32 %v4965_v55, %v4964_v14  ;;  %v5101_v27 = vpop.f32.mrb[8].mxu1 }
 0x146   : > { %v5102_v47 = vpop.f32.mrb[9].mxu1 }
 0x147   : > { %v6773_v58 = vadd.f32 %v4966_v42, %v6709_v11  ;;  %v6780_v60 = vadd.f32 %v5102_v47, %v5101_v27  ;;  %v5104_v11 = vpop.f32.mrb[10].mxu1 }
 0x148   : > { %v5105_v50 = vpop.f32.mrb[11].mxu1 }
 0x149   : > { %v4967_v8 = vpop.f32.mrb[36].mxu0  ;;  %v6785_v54 = vadd.f32 %v5105_v50, %v5104_v11 }
 0x14a   : > { %v4968_v22 = vpop.f32.mrb[37].mxu0 }
 0x14b   : > { %v4969_v39 = vadd.f32 %v4968_v22, %v4967_v8  ;;  %v4970_v23 = vpop.f32.mrb[38].mxu0 }
 0x14c   : > { %v4971_v57 = vpop.f32.mrb[39].mxu0 }
 0x14d   : > { %v6778_v4 = vadd.f32 %v4969_v39, %v6711_v61  ;;  %v4972_v3 = vadd.f32 %v4971_v57, %v4970_v23  ;;  %v5107_v5 = vpop.f32.mrb[12].mxu1 }
 0x14e   : > { %v5108_v15 = vpop.f32.mrb[13].mxu1 }
 0x14f   : > { %v6783_v26 = vadd.f32 %v4972_v3, %v6713_v10  ;;  %v6793_v35 = vadd.f32 %v5108_v15, %v5107_v5  ;;  %v5110_v25 = vpop.f32.mrb[14].mxu1 }
 0x150   : > { %v5111_v52 = vpop.f32.mrb[15].mxu1 }
 0x151   : > { %v4973_v37 = vpop.f32.mrb[40].mxu0  ;;  %v6798_v24 = vadd.f32 %v5111_v52, %v5110_v25 }
 0x152   : > { %v4974_v61 = vpop.f32.mrb[41].mxu0 }
 0x153   : > { %v4975_v51 = vadd.f32 %v4974_v61, %v4973_v37  ;;  %v4976_v18 = vpop.f32.mrb[42].mxu0 }
 0x154   : > { %v4977_v38 = vpop.f32.mrb[43].mxu0 }
 0x155   : > { %v6791_v56 = vadd.f32 %v4975_v51, %v6721_v1  ;;  %v4978_v10 = vadd.f32 %v4977_v38, %v4976_v18  ;;  %v5113_v45 = vpop.f32.mrb[16].mxu1 }
 0x156   : > { %v5114_v40 = vpop.f32.mrb[17].mxu1 }
 0x157   : > { %v6796_v46 = vadd.f32 %v4978_v10, %v6723_v21  ;;  %v6803_v32 = vadd.f32 %v5114_v40, %v5113_v45  ;;  %v5116_v14 = vpop.f32.mrb[18].mxu1 }
 0x158   : > { %v5117_v31 = vpop.f32.mrb[19].mxu1 }
 0x159   : > { %v4979_v33 = vpop.f32.mrb[44].mxu0  ;;  %v6808_v55 = vadd.f32 %v5117_v31, %v5116_v14 }
 0x15a   : > { %v4980_v7 = vpop.f32.mrb[45].mxu0 }
 0x15b   : > { %v4981_v41 = vadd.f32 %v4980_v7, %v4979_v33  ;;  %v4982_v9 = vpop.f32.mrb[46].mxu0 }
 0x15c   : > { %v4983_v28 = vpop.f32.mrb[47].mxu0 }
 0x15d   : > { %v6801_v1 = vadd.f32 %v4981_v41, %v6731_v36  ;;  %v4984_v49 = vadd.f32 %v4983_v28, %v4982_v9  ;;  %v5119_v20 = vpop.f32.mrb[20].mxu1 }
 0x15e   : > { %v5120_v22 = vpop.f32.mrb[21].mxu1 }
 0x15f   : > { %v6806_v21 = vadd.f32 %v4984_v49, %v6733_v0  ;;  %v6813_v23 = vadd.f32 %v5120_v22, %v5119_v20  ;;  %v5122_v27 = vpop.f32.mrb[22].mxu1 }
 0x160   : > { %v5123_v57 = vpop.f32.mrb[23].mxu1 }
 0x161   : > { %v4985_v30 = vpop.f32.mrb[48].mxu0  ;;  %v6818_v47 = vadd.f32 %v5123_v57, %v5122_v27 }
 0x162   : > { %v4986_v42 = vpop.f32.mrb[49].mxu0 }
 0x163   : > { %v4987_v48 = vadd.f32 %v4986_v42, %v4985_v30  ;;  %v4988_v62 = vpop.f32.mrb[50].mxu0 }
 0x164   : > { %v4989_v8 = vpop.f32.mrb[51].mxu0 }
 0x165   : > { %v6811_v36 = vadd.f32 %v4987_v48, %v6741_v53  ;;  %v4990_v39 = vadd.f32 %v4989_v8, %v4988_v62  ;;  %v5125_v61 = vpop.f32.mrb[24].mxu1 }
 0x166   : > { %v5126_v18 = vpop.f32.mrb[25].mxu1 }
 0x167   : > { %v6816_v0 = vadd.f32 %v4990_v39, %v6743_v44  ;;  %v6823_v38 = vadd.f32 %v5126_v18, %v5125_v61  ;;  %v5128_v15 = vpop.f32.mrb[26].mxu1  ;;  %v6850_v61 = vld [vmem:[%s7381_s4] ss:$0 sm:$0xff] }
 0x168   : > { %v5129_v10 = vpop.f32.mrb[27].mxu1 }
 0x169   : > { %v4991_v3 = vpop.f32.mrb[52].mxu0  ;;  %v6828_v25 = vadd.f32 %v5129_v10, %v5128_v15 }
 0x16a   : > { %v4992_v11 = vpop.f32.mrb[53].mxu0 }
 0x16b   : > { %v4993_v50 = vadd.f32 %v4992_v11, %v4991_v3  ;;  %v4994_v37 = vpop.f32.mrb[54].mxu0 }
 0x16c   : > { %v4995_v51 = vpop.f32.mrb[55].mxu0 }
 0x16d   : > { %v6821_v53 = vadd.f32 %v4993_v50, %v6745_v13  ;;  %v4996_v5 = vadd.f32 %v4995_v51, %v4994_v37  ;;  %v5131_v9 = vpop.f32.mrb[28].mxu1 }
 0x16e   : > { %v5132_v28 = vpop.f32.mrb[29].mxu1 }
 0x16f   : > { %v6826_v44 = vadd.f32 %v4996_v5, %v6747_v12  ;;  %v6833_v49 = vadd.f32 %v5132_v28, %v5131_v9  ;;  %v5134_v14 = vpop.f32.mrb[30].mxu1 }
 0x170   : > { %v5135_v31 = vpop.f32.mrb[31].mxu1 }
 0x171   : > { %v4997_v52 = vpop.f32.mrb[56].mxu0  ;;  %v6838_v30 = vadd.f32 %v5135_v31, %v5134_v14 }
 0x172   : > { %v4998_v33 = vpop.f32.mrb[57].mxu0 }
 0x173   : > { %v4999_v7 = vadd.f32 %v4998_v33, %v4997_v52  ;;  %v5000_v41 = vpop.f32.mrb[58].mxu0 }
 0x174   : > { %v5001_v45 = vpop.f32.mrb[59].mxu0 }
 0x175   : > { %v6831_v13 = vadd.f32 %v4999_v7, %v6749_v17  ;;  %v5002_v40 = vadd.f32 %v5001_v45, %v5000_v41 }
 0x177   : > { %v6836_v12 = vadd.f32 %v5002_v40, %v6751_v6 }
 0x179   : > { %v5003_v42 = vpop.f32.mrb[60].mxu0 }
 0x17a   : > { %v5004_v48 = vpop.f32.mrb[61].mxu0 }
 0x17b   : > { %v5005_v62 = vadd.f32 %v5004_v48, %v5003_v42  ;;  %v5006_v20 = vpop.f32.mrb[62].mxu0 }
 0x17c   : > { %v5007_v8 = vpop.f32.mrb[63].mxu0 }
 0x17d   : > { %v6841_v22 = vadd.f32 %v5005_v62, %v6759_v63  ;;  %v5008_v17 = vadd.f32 %v5007_v8, %v5006_v20 }
 0x17f   : > { %v6844_v39 = vadd.f32 %v5008_v17, %v6763_v16 }
 0x181   : > { %v5025_v27 = vpop.f32.mrb[64].mxu0 }
 0x182   : > { %v5026_v57 = vpop.f32.mrb[65].mxu0 }
 0x183   : > { %v5027_v3 = vadd.f32 %v5026_v57, %v5025_v27  ;;  %v5028_v11 = vpop.f32.mrb[66].mxu0 }
 0x184   : > { %v5029_v6 = vpop.f32.mrb[67].mxu0 }
 0x185   : > { %v1413_v50 = vadd.f32 %v5027_v3, %v6768_v19  ;;  %v5030_v37 = vadd.f32 %v5029_v6, %v5028_v11 }
 0x187   : > { %v1732_v63 = vadd.f32 %v6761_v59, %v1413_v50  ;;  %v1414_v51 = vadd.f32 %v5030_v37, %v6773_v58 }
 0x189   : > { %v1754_v16 = vadd.f32 %v6850_v61, %v1732_v63  ;;  %v1733_v18 = vadd.f32 %v6765_v34, %v1414_v51  ;;  %v5031_v5 = vpop.f32.mrb[68].mxu0 }
 0x18a   : > { %v5032_v15 = vpop.f32.mrb[69].mxu0 }
 0x18b   : > { %v1770_v10 = vmax.f32 %v1754_v16, 0.0  ;;  %v1755_v52 = vadd.f32 %v6850_v61, %v1733_v18  ;;  %v5033_v19 = vadd.f32 %v5032_v15, %v5031_v5  ;;  %v5034_v33 = vpop.f32.mrb[70].mxu0 }
 0x18c   : > { %v5035_v7 = vpop.f32.mrb[71].mxu0 }
 0x18d   : > { %1786 = vst [vmem:[#allocation2] sm:$0xff] %v1770_v10  ;;  %v1771_v41 = vmax.f32 %v1755_v52, 0.0  ;;  %v1415_v9 = vadd.f32 %v5033_v19, %v6778_v4  ;;  %v5036_v45 = vadd.f32 %v5035_v7, %v5034_v33 }
 0x18f   : > { %1787 = vst [vmem:[#allocation2 + $0x8] sm:$0xff] %v1771_v41  ;;  %v1734_v59 = vadd.f32 %v6770_v43, %v1415_v9  ;;  %v1416_v58 = vadd.f32 %v5036_v45, %v6783_v26  ;;  %v6860_v28 = vpack.c.bf16 %v1771_v41, %v1770_v10 }
 0x191   : > { %v1756_v34 = vadd.f32 %v6850_v61, %v1734_v59  ;;  %v1735_v40 = vadd.f32 %v6775_v2, %v1416_v58  ;;  %v5037_v14 = vpop.f32.mrb[72].mxu0 }
 0x192   : > { %v5038_v31 = vpop.f32.mrb[73].mxu0 }
 0x193   : > { %v1772_v42 = vmax.f32 %v1756_v34, 0.0  ;;  %v1757_v48 = vadd.f32 %v6850_v61, %v1735_v40  ;;  %v5039_v62 = vadd.f32 %v5038_v31, %v5037_v14  ;;  %v5040_v20 = vpop.f32.mrb[74].mxu0 }
 0x194   : > { %v5041_v4 = vpop.f32.mrb[75].mxu0 }
 0x195   : > { %1788 = vst [vmem:[#allocation2 + $0x10] sm:$0xff] %v1772_v42  ;;  %v1773_v8 = vmax.f32 %v1757_v48, 0.0  ;;  %v1417_v43 = vadd.f32 %v5039_v62, %v6791_v56  ;;  %v5042_v17 = vadd.f32 %v5041_v4, %v5040_v20 }
 0x196   : > { %v1842_v16 = vld [vmem:[#allocation2 + $0x1] sm:$0xff] }
 0x197   : > { %1789 = vst [vmem:[#allocation2 + $0x18] sm:$0xff] %v1773_v8  ;;  %v1736_v26 = vadd.f32 %v6780_v60, %v1417_v43  ;;  %v1418_v27 = vadd.f32 %v5042_v17, %v6796_v46  ;;  %v6868_v57 = vpack.c.bf16 %v1773_v8, %v1772_v42  ;;  %v5920_v8 = vld [vmem:[%s7379_s2 + $0x10] sm:$0xff]  }
 0x199   : > { %v1758_v2 = vadd.f32 %v6850_v61, %v1736_v26  ;;  %v1737_v3 = vadd.f32 %v6785_v54, %v1418_v27  ;;  %v5043_v11 = vpop.f32.mrb[76].mxu0 }
 0x19a   : > { %v5044_v6 = vpop.f32.mrb[77].mxu0 }
 0x19b   : > { %v1774_v50 = vmax.f32 %v1758_v2, 0.0  ;;  %v1759_v37 = vadd.f32 %v6850_v61, %v1737_v3  ;;  %v5045_v63 = vadd.f32 %v5044_v6, %v5043_v11  ;;  %v5046_v51 = vpop.f32.mrb[78].mxu0 }
 0x19c   : > { %v5047_v56 = vpop.f32.mrb[79].mxu0  ;;  %v1843_v18 = vld [vmem:[#allocation2 + $0x9] sm:$0xff] }
 0x19d   : > { %1790 = vst [vmem:[#allocation2 + $0x20] sm:$0xff] %v1774_v50  ;;  %v1775_v60 = vmax.f32 %v1759_v37, 0.0  ;;  %v1419_v46 = vadd.f32 %v5045_v63, %v6801_v1  ;;  %v5048_v5 = vadd.f32 %v5047_v56, %v5046_v51  ;;  %v1858_v15 = vpack.c.bf16 %v1843_v18, %v1842_v16  ;;  %v5922_v18 = vld [vmem:[%s7379_s2 + $0x20] sm:$0xff]  }
 0x19e   : > { %v1844_v34 = vld [vmem:[#allocation2 + $0x11] sm:$0xff] }
 0x19f   : > { %1791 = vst [vmem:[#allocation2 + $0x28] sm:$0xff] %v1775_v60  ;;  %v1738_v10 = vadd.f32 %v6793_v35, %v1419_v46  ;;  %v1420_v54 = vadd.f32 %v5048_v5, %v6806_v21  ;;  %5325 = vmatprep.mubr.bf16.mxu0 %v1858_v15  ;;  %v6876_v52 = vpack.c.bf16 %v1775_v60, %v1774_v50  ;;  %v5921_v50 = vld [vmem:[%s7379_s2 + $0x18] sm:$0xff]  }
 0x1a1   : > { %v1760_v19 = vadd.f32 %v6850_v61, %v1738_v10  ;;  %v1739_v33 = vadd.f32 %v6798_v24, %v1420_v54  ;;  %v5049_v7 = vpop.f32.mrb[80].mxu0  ;;  %v5919_v24 = vld [vmem:[%s7379_s2 + $0x8] sm:$0xff]  }
 0x1a2   : > { %v5050_v41 = vpop.f32.mrb[81].mxu0 }
 0x1a3   : > { %v1776_v9 = vmax.f32 %v1760_v19, 0.0  ;;  %v1761_v45 = vadd.f32 %v6850_v61, %v1739_v33  ;;  %v5051_v1 = vadd.f32 %v5050_v41, %v5049_v7  ;;  %v5052_v59 = vpop.f32.mrb[82].mxu0 }
 0x1a4   : > { %v5053_v58 = vpop.f32.mrb[83].mxu0  ;;  %v1845_v40 = vld [vmem:[#allocation2 + $0x19] sm:$0xff] }
 0x1a5   : > { %1792 = vst [vmem:[#allocation2 + $0x30] sm:$0xff] %v1776_v9  ;;  %v1777_v35 = vmax.f32 %v1761_v45, 0.0  ;;  %v1421_v21 = vadd.f32 %v5051_v1, %v6811_v36  ;;  %v5054_v14 = vadd.f32 %v5053_v58, %v5052_v59  ;;  %v1859_v31 = vpack.c.bf16 %v1845_v40, %v1844_v34  ;;  %v5923_v45 = vld [vmem:[%s7379_s2 + $0x28] sm:$0xff]  }
 0x1a6   : > { %v1846_v2 = vld [vmem:[#allocation2 + $0x21] sm:$0xff] }
 0x1a7   : > { %1793 = vst [vmem:[#allocation2 + $0x38] sm:$0xff] %v1777_v35  ;;  %v1740_v42 = vadd.f32 %v6803_v32, %v1421_v21  ;;  %v1422_v48 = vadd.f32 %v5054_v14, %v6816_v0  ;;  %5326 = vmatmul.mubr.bf16.vlgmr.msra.gmra.mrb[96].mxu0 %v1859_v31  ;;  %v6887_v62 = vpack.c.bf16 %v1777_v35, %v1776_v9  ;;  %v5924_v35 = vld [vmem:[%s7379_s2 + $0x30] sm:$0xff]  }
 0x1a8   : > { %5342 = vmatpush3.bf16.msra.mxu0 %v6756_v29 }
 0x1a9   : > { %v1762_v20 = vadd.f32 %v6850_v61, %v1740_v42  ;;  %v1741_v36 = vadd.f32 %v6808_v55, %v1422_v48  ;;  %v5055_v4 = vpop.f32.mrb[84].mxu0  ;;  %5343 = vmatprep.subr.bf16.mxu0 %v5919_v24 }
 0x1aa   : > { %v5056_v43 = vpop.f32.mrb[85].mxu0 }
 0x1ab   : > { %v1778_v17 = vmax.f32 %v1762_v20, 0.0  ;;  %v1763_v32 = vadd.f32 %v6850_v61, %v1741_v36  ;;  %v5057_v0 = vadd.f32 %v5056_v43, %v5055_v4  ;;  %v5058_v26 = vpop.f32.mrb[86].mxu0 }
 0x1ac   : > { %v5059_v27 = vpop.f32.mrb[87].mxu0  ;;  %v1847_v3 = vld [vmem:[#allocation2 + $0x29] sm:$0xff]  ;;  %5344 = vmatpush3.bf16.msra.mxu0 %v5919_v24 }
 0x1ad   : > { %1794 = vst [vmem:[#allocation2 + $0x40] sm:$0xff] %v1778_v17  ;;  %v1779_v29 = vmax.f32 %v1763_v32, 0.0  ;;  %v1423_v55 = vadd.f32 %v5057_v0, %v6821_v53  ;;  %v5060_v11 = vadd.f32 %v5059_v27, %v5058_v26  ;;  %v1860_v6 = vpack.c.bf16 %v1847_v3, %v1846_v2  ;;  %5345 = vmatprep.subr.bf16.mxu0 %v5920_v8 }
 0x1ae   : > { %v1848_v54 = vld [vmem:[#allocation2 + $0x31] sm:$0xff] }
 0x1af   : > { %1795 = vst [vmem:[#allocation2 + $0x48] sm:$0xff] %v1779_v29  ;;  %v1742_v37 = vadd.f32 %v6813_v23, %v1423_v55  ;;  %v1424_v63 = vadd.f32 %v5060_v11, %v6826_v44  ;;  %5329 = vmatprep.mubr.bf16.mxu0 %v1860_v6  ;;  %v6902_v51 = vpack.c.bf16 %v1779_v29, %v1778_v17  ;;  %v6912_v23 = vld [vmem:[%s7380_s3 + $0x20] sm:$0xff]  }
 0x1b0   : > { %5346 = vmatpush3.bf16.msra.mxu0 %v5920_v8  ;;  %5653 = vmatprep.subr.bf16.mxu1 %v6912_v23  ;;  %v5925_v8 = vld [vmem:[%s7379_s2 + $0x38] sm:$0xff]  }
 0x1b1   : > { %v1764_v56 = vadd.f32 %v6850_v61, %v1742_v37  ;;  %v1743_v53 = vadd.f32 %v6818_v47, %v1424_v63  ;;  %v5061_v16 = vpop.f32.mrb[88].mxu0  ;;  %5347 = vmatprep.subr.bf16.mxu0 %v5921_v50  ;;  %v6919_v47 = vld [vmem:[%s7380_s3 + $0x28] sm:$0xff]   ;;  %5657 = vmatpush3.bf16.msra.mxu1 %v6912_v23 }
 0x1b2   : > { %v5062_v44 = vpop.f32.mrb[89].mxu0  ;;  %5654 = vmatprep.subr.bf16.mxu1 %v6919_v47 }
 0x1b3   : > { %v1780_v60 = vmax.f32 %v1764_v56, 0.0  ;;  %v1765_v46 = vadd.f32 %v6850_v61, %v1743_v53  ;;  %v5063_v5 = vadd.f32 %v5062_v44, %v5061_v16  ;;  %v5064_v15 = vpop.f32.mrb[90].mxu0  ;;  %v5928_v56 = vld [vmem:[%s7379_s2 + $0x90] sm:$0xff]   ;;  %v5933_v16 = vld [vmem:[%s7379_s2 + $0xb8] sm:$0xff]   ;;  %v5934_v44 = vld [vmem:[%s7379_s2 + $0xc0] sm:$0xff]  }
 0x1b4   : > { %v5065_v10 = vpop.f32.mrb[91].mxu0  ;;  %v1849_v19 = vld [vmem:[#allocation2 + $0x39] sm:$0xff]  ;;  %5348 = vmatpush3.bf16.msra.mxu0 %v5921_v50  ;;  %v2173_v53 = vld [vmem:[#allocation2 + $0xb] sm:$0xff] }
 0x1b5   : > { %1796 = vst [vmem:[#allocation2 + $0x50] sm:$0xff] %v1780_v60  ;;  %v1781_v33 = vmax.f32 %v1765_v46, 0.0  ;;  %v1425_v7 = vadd.f32 %v5063_v5, %v6831_v13  ;;  %v5066_v41 = vadd.f32 %v5065_v10, %v5064_v15  ;;  %v1861_v9 = vpack.c.bf16 %v1849_v19, %v1848_v54  ;;  %5349 = vmatprep.subr.bf16.mxu0 %v5922_v18  ;;  %v2178_v46 = vld [vmem:[#allocation2 + $0x33] sm:$0xff]  ;;  %v2175_v5 = vld [vmem:[#allocation2 + $0x1b] sm:$0xff]  ;;  %v2177_v10 = vld [vmem:[#allocation2 + $0x2b] sm:$0xff] }
 0x1b6   : > { %5658 = vmatpush3.bf16.msra.mxu1 %v6919_v47  ;;  %v1850_v42 = vld [vmem:[#allocation2 + $0x41] sm:$0xff]  ;;  %v2191_v19 = vpack.c.bf16 %v2178_v46, %v2177_v10 }
 0x1b7   : > { %1797 = vst [vmem:[#allocation2 + $0x58] sm:$0xff] %v1781_v33  ;;  %v1744_v1 = vadd.f32 %v6823_v38, %v1425_v7  ;;  %v1426_v59 = vadd.f32 %v5066_v41, %v6836_v12  ;;  %5330 = vmatmul.mubr.bf16.gmra.mrb[100].mxu0 %v1861_v9  ;;  %v6929_v58 = vpack.c.bf16 %v1781_v33, %v1780_v60  ;;  %v2176_v60 = vld [vmem:[#allocation2 + $0x23] sm:$0xff]  ;;  %v5936_v33 = vld [vmem:[%s7379_s2 + $0xd0] sm:$0xff]   ;;  %v2179_v9 = vld [vmem:[#allocation2 + $0x3b] sm:$0xff] }
 0x1b8   : > { %5350 = vmatpush3.bf16.msra.mxu0 %v5922_v18  ;;  %v2190_v15 = vpack.c.bf16 %v2176_v60, %v2175_v5  ;;  %v5935_v54 = vld [vmem:[%s7379_s2 + $0xc8] sm:$0xff]  }
 0x1b9   : > { %v1766_v13 = vadd.f32 %v6850_v61, %v1744_v1  ;;  %v1745_v34 = vadd.f32 %v6828_v25, %v1426_v59  ;;  %v5067_v40 = vpop.f32.mrb[92].mxu0  ;;  %5351 = vmatprep.subr.bf16.mxu0 %v5923_v45  ;;  %v2180_v7 = vld [vmem:[#allocation2 + $0x43] sm:$0xff]  ;;  %v5937_v59 = vld [vmem:[%s7379_s2 + $0xd8] sm:$0xff]  }
 0x1ba   : > { %v5068_v21 = vpop.f32.mrb[93].mxu0 }
 0x1bb   : > { %v1782_v38 = vmax.f32 %v1766_v13, 0.0  ;;  %v1767_v12 = vadd.f32 %v6850_v61, %v1745_v34  ;;  %v5069_v14 = vadd.f32 %v5068_v21, %v5067_v40  ;;  %v5070_v31 = vpop.f32.mrb[94].mxu0  ;;  %v5938_v13 = vld [vmem:[%s7379_s2 + $0xe0] sm:$0xff]  }
 0x1bc   : > { %v5071_v24 = vpop.f32.mrb[95].mxu0  ;;  %v1851_v48 = vld [vmem:[#allocation2 + $0x49] sm:$0xff]  ;;  %5352 = vmatpush3.bf16.msra.mxu0 %v5923_v45  ;;  %v2192_v45 = vpack.c.bf16 %v2180_v7, %v2179_v9 }
 0x1bd   : > { %1798 = vst [vmem:[#allocation2 + $0x60] sm:$0xff] %v1782_v38  ;;  %v1783_v20 = vmax.f32 %v1767_v12, 0.0  ;;  %v1427_v25 = vadd.f32 %v5069_v14, %v6841_v22  ;;  %v5072_v36 = vadd.f32 %v5071_v24, %v5070_v31  ;;  %v1862_v4 = vpack.c.bf16 %v1851_v48, %v1850_v42  ;;  %5353 = vmatprep.subr.bf16.mxu0 %v5924_v35  ;;  %v5926_v22 = vld [vmem:[%s7379_s2 + $0x80] sm:$0xff]   ;;  %v2181_v1 = vld [vmem:[#allocation2 + $0x4b] sm:$0xff]  ;;  %v2376_v48 = vld [vmem:[#allocation2 + $0x14] sm:$0xff] }
 0x1be   : > { %v1852_v3 = vld [vmem:[#allocation2 + $0x51] sm:$0xff]  ;;  %v5939_v12 = vld [vmem:[%s7379_s2 + $0xe8] sm:$0xff]  }
 0x1bf   : > { %1799 = vst [vmem:[#allocation2 + $0x68] sm:$0xff] %v1783_v20  ;;  %v1746_v43 = vadd.f32 %v6833_v49, %v1427_v25  ;;  %v1428_v17 = vadd.f32 %v5072_v36, %v6844_v39  ;;  %5333 = vmatprep.mubr.bf16.mxu0 %v1862_v4  ;;  %v1824_v32 = vpack.c.bf16 %v1783_v20, %v1782_v38  ;;  %v2182_v41 = vld [vmem:[#allocation2 + $0x53] sm:$0xff]  ;;  %v2188_v42 = vld [vmem:[#allocation2 + $0x83] sm:$0xff] }
 0x1c0   : > { %5354 = vmatpush3.bf16.msra.mxu0 %v5924_v35  ;;  %v5940_v31 = vld [vmem:[%s7379_s2 + $0xf0] sm:$0xff]   ;;  %v5941_v36 = vld [vmem:[%s7379_s2 + $0xf8] sm:$0xff]  }
 0x1c1   : > { %v1768_v0 = vadd.f32 %v6850_v61, %v1746_v43  ;;  %v1747_v26 = vadd.f32 %v6838_v30, %v1428_v17  ;;  %5355 = vmatprep.subr.bf16.mxu0 %v5925_v8  ;;  %v2375_v25 = vld [vmem:[#allocation2 + $0xc] sm:$0xff]  ;;  %v2380_v43 = vld [vmem:[#allocation2 + $0x34] sm:$0xff]  ;;  %v2377_v17 = vld [vmem:[#allocation2 + $0x1c] sm:$0xff] }
 0x1c2   : > { %v2391_v4 = vpack.c.bf16 %v2376_v48, %v2375_v25 }
 0x1c3   : > { %v1784_v27 = vmax.f32 %v1768_v0, 0.0  ;;  %v1769_v2 = vadd.f32 %v6850_v61, %v1747_v26  ;;  %v5927_v61 = vld [vmem:[%s7379_s2 + $0x88] sm:$0xff]  }
 0x1c4   : > { %v1853_v29 = vld [vmem:[#allocation2 + $0x59] sm:$0xff]  ;;  %5356 = vmatpush3.bf16.msra.mxu0 %v5925_v8  ;;  %v2378_v8 = vld [vmem:[#allocation2 + $0x24] sm:$0xff]  ;;  %v2379_v0 = vld [vmem:[#allocation2 + $0x2c] sm:$0xff] }
 0x1c5   : > { %1800 = vst [vmem:[#allocation2 + $0x70] sm:$0xff] %v1784_v27  ;;  %v1785_v49 = vmax.f32 %v1769_v2, 0.0  ;;  %v1863_v39 = vpack.c.bf16 %v1853_v29, %v1852_v3  ;;  %5373 = vmatprep.subr.bf16.mxu0 %v5926_v22  ;;  %v2183_v35 = vld [vmem:[#allocation2 + $0x5b] sm:$0xff]  ;;  %v2393_v26 = vpack.c.bf16 %v2380_v43, %v2379_v0  ;;  %v2383_v29 = vld [vmem:[#allocation2 + $0x4c] sm:$0xff] }
 0x1c6   : > { %v1854_v11 = vld [vmem:[#allocation2 + $0x61] sm:$0xff] }
 0x1c7   : > { %1801 = vst [vmem:[#allocation2 + $0x78] sm:$0xff] %v1785_v49  ;;  %5334 = vmatmul.mubr.bf16.gmra.mrb[104].mxu0 %v1863_v39  ;;  %v1825_v55 = vpack.c.bf16 %v1785_v49, %v1784_v27  ;;  %v2184_v34 = vld [vmem:[#allocation2 + $0x63] sm:$0xff]  ;;  %v2384_v27 = vld [vmem:[#allocation2 + $0x54] sm:$0xff] }
 0x1c8   : > { %v2194_v21 = vpack.c.bf16 %v2184_v34, %v2183_v35  ;;  %v2381_v2 = vld [vmem:[#allocation2 + $0x3c] sm:$0xff]  ;;  %v2395_v49 = vpack.c.bf16 %v2384_v27, %v2383_v29  ;;  %v2386_v39 = vld [vmem:[#allocation2 + $0x64] sm:$0xff] }
 0x1cc   : > { %v1855_v30 = vld [vmem:[#allocation2 + $0x69] sm:$0xff] }
 0x1cd   : > { %v1864_v6 = vpack.c.bf16 %v1855_v30, %v1854_v11  ;;  %v2185_v38 = vld [vmem:[#allocation2 + $0x6b] sm:$0xff]  ;;  %v2385_v11 = vld [vmem:[#allocation2 + $0x5c] sm:$0xff] }
 0x1ce   : > { %v1856_v50 = vld [vmem:[#allocation2 + $0x71] sm:$0xff]  ;;  %v1857_v37 = vld [vmem:[#allocation2 + $0x79] sm:$0xff]  ;;  %v2396_v30 = vpack.c.bf16 %v2386_v39, %v2385_v11 }
 0x1cf   : > { %5337 = vmatprep.mubr.bf16.mxu0 %v1864_v6  ;;  %v1865_v63 = vpack.c.bf16 %v1857_v37, %v1856_v50  ;;  %v2186_v40 = vld [vmem:[#allocation2 + $0x73] sm:$0xff]  ;;  %v2187_v24 = vld [vmem:[#allocation2 + $0x7b] sm:$0xff]  ;;  %v2390_v37 = vld [vmem:[#allocation2 + $0x84] sm:$0xff] }
 0x1d0   : > { %v2195_v14 = vpack.c.bf16 %v2186_v40, %v2185_v38  ;;  %v2196_v20 = vpack.c.bf16 %v2188_v42, %v2187_v24  ;;  %v2387_v6 = vld [vmem:[#allocation2 + $0x6c] sm:$0xff] }
 0x1d1   : > { %5338 = vmatmul.mubr.bf16.gmra.mrb[108].mxu0 %v1865_v63 }
 0x1d2   : > { %5357 = vmatprep.mubr.bf16.mxu0 %v6860_v28  ;;  %v5929_v28 = vld [vmem:[%s7379_s2 + $0x98] sm:$0xff]  }
 0x1d9   : > { %5358 = vmatmul.mubr.bf16.vlgmr.msra.gmra.mrb[96].mxu0 %v6868_v57  ;;  %v5930_v57 = vld [vmem:[%s7379_s2 + $0xa0] sm:$0xff]  }
 0x1da   : > { %5361 = vmatprep.mubr.bf16.mxu0 %v6876_v52  ;;  %5374 = vmatpush3.bf16.msra.mxu0 %v5926_v22  ;;  %v5931_v52 = vld [vmem:[%s7379_s2 + $0xa8] sm:$0xff]  }
 0x1db   : > { %5375 = vmatprep.subr.bf16.mxu0 %v5927_v61  ;;  %v2382_v22 = vld [vmem:[#allocation2 + $0x44] sm:$0xff] }
 0x1dc   : > { %v2394_v3 = vpack.c.bf16 %v2382_v22, %v2381_v2 }
 0x1de   : > { %5376 = vmatpush3.bf16.msra.mxu0 %v5927_v61  ;;  %v5945_v61 = vld [vmem:[%s7380_s3 + $0x38] sm:$0xff]  }
 0x1df   : > { %5377 = vmatprep.subr.bf16.mxu0 %v5928_v56 }
 0x1e1   : > { %5362 = vmatmul.mubr.bf16.gmra.mrb[100].mxu0 %v6887_v62  ;;  %v5932_v62 = vld [vmem:[%s7379_s2 + $0xb0] sm:$0xff]  }
 0x1e2   : > { %5365 = vmatprep.mubr.bf16.mxu0 %v6902_v51  ;;  %5378 = vmatpush3.bf16.msra.mxu0 %v5928_v56  ;;  %v2174_v51 = vld [vmem:[#allocation2 + $0x13] sm:$0xff]  ;;  %v7014_v56 = vld [vmem:[%s7380_s3] sm:$0xff]  }
 0x1e3   : > { %5379 = vmatprep.subr.bf16.mxu0 %v5929_v28  ;;  %v2189_v18 = vpack.c.bf16 %v2174_v51, %v2173_v53 }
 0x1e6   : > { %5380 = vmatpush3.bf16.msra.mxu0 %v5929_v28  ;;  %v7020_v28 = vld [vmem:[%s7382_s5] ss:$0 sm:$0xff] }
 0x1e7   : > { %5381 = vmatprep.subr.bf16.mxu0 %v5930_v57 }
 0x1e9   : > { %5366 = vmatmul.mubr.bf16.gmra.mrb[104].mxu0 %v6929_v58  ;;  %v2193_v58 = vpack.c.bf16 %v2182_v41, %v2181_v1 }
 0x1ea   : > { %5369 = vmatprep.mubr.bf16.mxu0 %v1824_v32  ;;  %5382 = vmatpush3.bf16.msra.mxu0 %v5930_v57  ;;  %v2392_v32 = vpack.c.bf16 %v2378_v8, %v2377_v17 }
 0x1eb   : > { %5383 = vmatprep.subr.bf16.mxu0 %v5931_v52 }
 0x1ee   : > { %5384 = vmatpush3.bf16.msra.mxu0 %v5931_v52 }
 0x1ef   : > { %5385 = vmatprep.subr.bf16.mxu0 %v5932_v62 }
 0x1f1   : > { %5370 = vmatmul.mubr.bf16.gmra.mrb[108].mxu0 %v1825_v55  ;;  %v2388_v55 = vld [vmem:[#allocation2 + $0x74] sm:$0xff] }
 0x1f2   : > { %5386 = vmatpush3.bf16.msra.mxu0 %v5932_v62  ;;  %5389 = vmatprep.mubr.bf16.mxu0 %v2189_v18  ;;  %v2397_v50 = vpack.c.bf16 %v2388_v55, %v2387_v6 }
 0x1f3   : > { %5387 = vmatprep.subr.bf16.mxu0 %v5933_v16 }
 0x1f6   : > { %5388 = vmatpush3.bf16.msra.mxu0 %v5933_v16 }
 0x1f7   : > { %5405 = vmatprep.subr.bf16.mxu0 %v5934_v44 }
 0x1f9   : > { %5390 = vmatmul.mubr.bf16.vlgmr.msra.gmra.mrb[96].mxu0 %v2190_v15 }
 0x1fa   : > { %5393 = vmatprep.mubr.bf16.mxu0 %v2191_v19  ;;  %5406 = vmatpush3.bf16.msra.mxu0 %v5934_v44 }
 0x1fb   : > { %5407 = vmatprep.subr.bf16.mxu0 %v5935_v54 }
 0x1fe   : > { %5408 = vmatpush3.bf16.msra.mxu0 %v5935_v54 }
 0x1ff   : > { %5409 = vmatprep.subr.bf16.mxu0 %v5936_v33 }
 0x201   : > { %5394 = vmatmul.mubr.bf16.gmra.mrb[100].mxu0 %v2192_v45 }
 0x202   : > { %5397 = vmatprep.mubr.bf16.mxu0 %v2193_v58  ;;  %5410 = vmatpush3.bf16.msra.mxu0 %v5936_v33 }
 0x203   : > { %5411 = vmatprep.subr.bf16.mxu0 %v5937_v59 }
 0x206   : > { %5412 = vmatpush3.bf16.msra.mxu0 %v5937_v59 }
 0x207   : > { %5413 = vmatprep.subr.bf16.mxu0 %v5938_v13 }
 0x209   : > { %5398 = vmatmul.mubr.bf16.gmra.mrb[104].mxu0 %v2194_v21 }
 0x20a   : > { %5401 = vmatprep.mubr.bf16.mxu0 %v2195_v14  ;;  %5414 = vmatpush3.bf16.msra.mxu0 %v5938_v13 }
 0x20b   : > { %5415 = vmatprep.subr.bf16.mxu0 %v5939_v12 }
 0x20e   : > { %5416 = vmatpush3.bf16.msra.mxu0 %v5939_v12 }
 0x20f   : > { %5417 = vmatprep.subr.bf16.mxu0 %v5940_v31 }
 0x211   : > { %5402 = vmatmul.mubr.bf16.gmra.mrb[108].mxu0 %v2196_v20 }
 0x212   : > { %5418 = vmatpush3.bf16.msra.mxu0 %v5940_v31  ;;  %5421 = vmatprep.mubr.bf16.mxu0 %v2391_v4 }
 0x213   : > { %5419 = vmatprep.subr.bf16.mxu0 %v5941_v36 }
 0x216   : > { %5420 = vmatpush3.bf16.msra.mxu0 %v5941_v36 }
 0x217   : > { %5437 = vmatprep.subr.bf16.mxu0 %v6912_v23 }
 0x219   : > { %5422 = vmatmul.mubr.bf16.vlgmr.msra.gmra.mrb[96].mxu0 %v2392_v32 }
 0x21a   : > { %5425 = vmatprep.mubr.bf16.mxu0 %v2393_v26  ;;  %5438 = vmatpush3.bf16.msra.mxu0 %v6912_v23  ;;  %v2389_v23 = vld [vmem:[#allocation2 + $0x7c] sm:$0xff] }
 0x21b   : > { %5439 = vmatprep.subr.bf16.mxu0 %v6919_v47  ;;  %v2398_v63 = vpack.c.bf16 %v2390_v37, %v2389_v23 }
 0x21e   : > { %5440 = vmatpush3.bf16.msra.mxu0 %v6919_v47  ;;  %v5944_v47 = vld [vmem:[%s7380_s3 + $0x30] sm:$0xff]  }
 0x21f   : > { %5655 = vmatprep.subr.bf16.mxu1 %v5944_v47  ;;  %5441 = vmatprep.subr.bf16.mxu0 %v5944_v47 }
 0x220   : > { %5659 = vmatpush3.bf16.msra.mxu1 %v5944_v47 }
 0x221   : > { %5426 = vmatmul.mubr.bf16.gmra.mrb[100].mxu0 %v2394_v3  ;;  %5656 = vmatprep.subr.bf16.mxu1 %v5945_v61 }
 0x222   : > { %5429 = vmatprep.mubr.bf16.mxu0 %v2395_v49  ;;  %5442 = vmatpush3.bf16.msra.mxu0 %v5944_v47 }
 0x223   : > { %5443 = vmatprep.subr.bf16.mxu0 %v5945_v61 }
 0x224   : > { %5660 = vmatpush3.bf16.msra.mxu1 %v5945_v61 }
 0x225   : > { %5461 = vmatprep.subr.bf16.mxu1 %v7014_v56 }
 0x226   : > { %5444 = vmatpush3.bf16.msra.mxu0 %v5945_v61 }
 0x229   : > { %5430 = vmatmul.mubr.bf16.gmra.mrb[104].mxu0 %v2396_v30 }
 0x22a   : > { %5433 = vmatprep.mubr.bf16.mxu0 %v2397_v50 }
 0x231   : > { %5434 = vmatmul.mubr.bf16.gmra.mrb[108].mxu0 %v2398_v63 }
 0x2ec   : > { %v5423_v57 = vpop.f32.mrb[96].mxu0 }
 0x2ed   : > { %v2585_v52 = vadd.f32 %v5423_v57, %v7020_v28  ;;  %v2498_v62 = vpop.f32.mrb[97].mxu0 }
 0x2ee   : > { %v2583_v51 = vadd.f32 %v7020_v28, %v2498_v62  ;;  %v5424_v53 = vpop.f32.mrb[98].mxu0 }
 0x2ef   : > { %v2601_v16 = vmax.f32 %v2585_v52, 0.0  ;;  %v2586_v18 = vadd.f32 %v5424_v53, %v7020_v28  ;;  %v2501_v44 = vpop.f32.mrb[99].mxu0 }
 0x2f0   : > { %v2599_v60 = vmax.f32 %v2583_v51, 0.0  ;;  %v2584_v46 = vadd.f32 %v7020_v28, %v2501_v44 }
 0x2f1   : > { %2617 = vst.msk [vmem:[#allocation3 + $0x10] sm:$0xff] %vm290_vm3, %v2601_v16  ;;  %v2602_v5 = vmax.f32 %v2586_v18, 0.0 }
 0x2f2   : > { %2615 = vst.msk [vmem:[#allocation3] sm:$0xff] %vm290_vm3, %v2599_v60  ;;  %v2600_v15 = vmax.f32 %v2584_v46, 0.0 }
 0x2f3   : > { %2618 = vst.msk [vmem:[#allocation3 + $0x18] sm:$0xff] %vm290_vm3, %v2602_v5 }
 0x2f4   : > { %2616 = vst.msk [vmem:[#allocation3 + $0x8] sm:$0xff] %vm290_vm3, %v2600_v15  ;;  %v5427_v10 = vpop.f32.mrb[100].mxu0 }
 0x2f5   : > { %v2589_v54 = vadd.f32 %v5427_v10, %v7020_v28  ;;  %v2514_v19 = vpop.f32.mrb[101].mxu0 }
 0x2f6   : > { %v2587_v33 = vadd.f32 %v7020_v28, %v2514_v19  ;;  %v5428_v7 = vpop.f32.mrb[102].mxu0 }
 0x2f7   : > { %v2605_v41 = vmax.f32 %v2589_v54, 0.0  ;;  %v2590_v9 = vadd.f32 %v5428_v7, %v7020_v28  ;;  %v2517_v45 = vpop.f32.mrb[103].mxu0 }
 0x2f8   : > { %v2603_v1 = vmax.f32 %v2587_v33, 0.0  ;;  %v2588_v59 = vadd.f32 %v7020_v28, %v2517_v45 }
 0x2f9   : > { %2621 = vst.msk [vmem:[#allocation3 + $0x30] sm:$0xff] %vm290_vm3, %v2605_v41  ;;  %v2606_v58 = vmax.f32 %v2590_v9, 0.0  ;;  %v5947_v41 = vld [vmem:[%s7380_s3 + $0x8] sm:$0xff]  }
 0x2fa   : > { %2619 = vst.msk [vmem:[#allocation3 + $0x20] sm:$0xff] %vm290_vm3, %v2603_v1  ;;  %v2604_v13 = vmax.f32 %v2588_v59, 0.0  ;;  %v2665_v36 = vld [vmem:[#allocation3 + $0x11] sm:$0xff] }
 0x2fb   : > { %2622 = vst.msk [vmem:[#allocation3 + $0x38] sm:$0xff] %vm290_vm3, %v2606_v58  ;;  %v2663_v34 = vld [vmem:[#allocation3 + $0x1] sm:$0xff]  ;;  %v2664_v40 = vld [vmem:[#allocation3 + $0x9] sm:$0xff]  ;;  %v7044_v43 = vld [vmem:[#allocation3 + $0x18] sm:$0xff] }
 0x2fc   : > { %2620 = vst.msk [vmem:[#allocation3 + $0x28] sm:$0xff] %vm290_vm3, %v2604_v13  ;;  %v5431_v35 = vpop.f32.mrb[104].mxu0  ;;  %v2679_v21 = vpack.c.bf16 %v2664_v40, %v2663_v34  ;;  %v5948_v40 = vld [vmem:[%s7380_s3 + $0x10] sm:$0xff]  }
 0x2fd   : > { %v2593_v38 = vadd.f32 %v5431_v35, %v7020_v28  ;;  %v2530_v12 = vpop.f32.mrb[105].mxu0 }
 0x2fe   : > { %v2591_v14 = vadd.f32 %v7020_v28, %v2530_v12  ;;  %v5432_v31 = vpop.f32.mrb[106].mxu0  ;;  %5445 = vmatprep.mubr.msk.bf16.mxu0 %vm290_vm3, %v2679_v21 }
 0x2ff   : > { %v2609_v24 = vmax.f32 %v2593_v38, 0.0  ;;  %v2594_v42 = vadd.f32 %v5432_v31, %v7020_v28  ;;  %v2533_v48 = vpop.f32.mrb[107].mxu0  ;;  %v2632_v38 = vld [vmem:[#allocation3 + $0x8] sm:$0xff]  ;;  %v5949_v31 = vld [vmem:[%s7380_s3 + $0x18] sm:$0xff]  }
 0x300   : > { %v2607_v20 = vmax.f32 %v2591_v14, 0.0  ;;  %v2592_v25 = vadd.f32 %v7020_v28, %v2533_v48  ;;  %v7049_v26 = vld [vmem:[#allocation3 + $0x30] sm:$0xff]  ;;  %v2631_v14 = vld [vmem:[#allocation3] sm:$0xff] }
 0x301   : > { %2625 = vst.msk [vmem:[#allocation3 + $0x50] sm:$0xff] %vm290_vm3, %v2609_v24  ;;  %v2610_v4 = vmax.f32 %v2594_v42, 0.0  ;;  %v2666_v8 = vld [vmem:[#allocation3 + $0x19] sm:$0xff]  ;;  %v2647_v24 = vpack.c.bf16 %v2632_v38, %v2631_v14  ;;  %v2633_v42 = vld [vmem:[#allocation3 + $0x10] sm:$0xff] }
 0x302   : > { %v7046_v17 = vld [vmem:[#allocation3 + $0x20] sm:$0xff]  ;;  %2623 = vst.msk [vmem:[#allocation3 + $0x40] sm:$0xff] %vm290_vm3, %v2607_v20  ;;  %v2608_v32 = vmax.f32 %v2592_v25, 0.0  ;;  %v2680_v0 = vpack.c.bf16 %v2666_v8, %v2665_v36  ;;  %v2669_v61 = vld [vmem:[#allocation3 + $0x31] sm:$0xff]  ;;  %v2648_v48 = vpack.c.bf16 %v7044_v43, %v2633_v42  ;;  %v5951_v20 = vld [vmem:[%s7380_s3 + $0x48] sm:$0xff]  }
 0x303   : > { %v4166_v22 = vpack.c.bf16 %v7046_v17, %v7044_v43  ;;  %2626 = vst.msk [vmem:[#allocation3 + $0x58] sm:$0xff] %vm290_vm3, %v2610_v4  ;;  %v2667_v27 = vld [vmem:[#allocation3 + $0x21] sm:$0xff]  ;;  %v2668_v2 = vld [vmem:[#allocation3 + $0x29] sm:$0xff]  ;;  %v7066_v62 = vld [vmem:[#allocation3 + $0x38] sm:$0xff] }
 0x304   : > { %v7054_v3 = vld [vmem:[#allocation3 + $0x28] sm:$0xff]  ;;  %2624 = vst.msk [vmem:[#allocation3 + $0x48] sm:$0xff] %vm290_vm3, %v2608_v32  ;;  %v5435_v29 = vpop.f32.mrb[108].mxu0  ;;  %5446 = vmatmul.mubr.msk.bf16.vlgmr.msra.gmra.mrb[112].mxu0 %vm290_vm3, %v2680_v0  ;;  %v2681_v49 = vpack.c.bf16 %v2668_v2, %v2667_v27  ;;  %v5952_v36 = vld [vmem:[%s7380_s3 + $0x50] sm:$0xff]   ;;  %v2650_v4 = vpack.c.bf16 %v7066_v62, %v7049_v26  ;;  %v5953_v8 = vld [vmem:[%s7380_s3 + $0x58] sm:$0xff]  }
 0x305   : > { %v4167_v39 = vpack.c.bf16 %v7049_v26, %v7054_v3  ;;  %v2597_v55 = vadd.f32 %v5435_v29, %v7020_v28  ;;  %v2546_v11 = vpop.f32.mrb[109].mxu0  ;;  %v2649_v25 = vpack.c.bf16 %v7054_v3, %v7046_v17  ;;  %v5954_v0 = vld [vmem:[%s7380_s3 + $0x60] sm:$0xff]   ;;  %v3180_v38 = vld [vmem:[#allocation3 + $0xb] sm:$0xff]  ;;  %v3185_v42 = vld [vmem:[#allocation3 + $0x33] sm:$0xff] }
 0x306   : > { %v2595_v30 = vadd.f32 %v7020_v28, %v2546_v11  ;;  %v5436_v6 = vpop.f32.mrb[110].mxu0  ;;  %5449 = vmatprep.mubr.msk.bf16.mxu0 %vm290_vm3, %v2681_v49  ;;  %v2986_v49 = vld [vmem:[#allocation3 + $0x2] sm:$0xff] }
 0x307   : > { %v2613_v50 = vmax.f32 %v2597_v55, 0.0  ;;  %v2598_v23 = vadd.f32 %v5436_v6, %v7020_v28  ;;  %v2549_v37 = vpop.f32.mrb[111].mxu0  ;;  %v2987_v55 = vld [vmem:[#allocation3 + $0xa] sm:$0xff]  ;;  %v2989_v6 = vld [vmem:[#allocation3 + $0x1a] sm:$0xff] }
 0x308   : > { %v2611_v63 = vmax.f32 %v2595_v30, 0.0  ;;  %v2596_v47 = vadd.f32 %v7020_v28, %v2549_v37  ;;  %v7071_v18 = vld [vmem:[#allocation3 + $0x50] sm:$0xff]  ;;  %v3002_v30 = vpack.c.bf16 %v2987_v55, %v2986_v49  ;;  %v5961_v49 = vld [vmem:[%s7380_s3 + $0x98] sm:$0xff]   ;;  %v4163_v43 = vld [vmem:[#allocation3 + $0x80] sm:$0xff] }
 0x309   : > { %2629 = vst.msk [vmem:[#allocation3 + $0x70] sm:$0xff] %vm290_vm3, %v2613_v50  ;;  %v2614_v57 = vmax.f32 %v2598_v23, 0.0  ;;  %v2670_v52 = vld [vmem:[#allocation3 + $0x39] sm:$0xff]  ;;  %v2990_v50 = vld [vmem:[#allocation3 + $0x22] sm:$0xff]  ;;  %v2991_v23 = vld [vmem:[#allocation3 + $0x2a] sm:$0xff] }
 0x30a   : > { %v7068_v51 = vld [vmem:[#allocation3 + $0x40] sm:$0xff]  ;;  %2627 = vst.msk [vmem:[#allocation3 + $0x60] sm:$0xff] %vm290_vm3, %v2611_v63  ;;  %v2612_v53 = vmax.f32 %v2596_v47, 0.0  ;;  %v2682_v16 = vpack.c.bf16 %v2670_v52, %v2669_v61  ;;  %v2673_v10 = vld [vmem:[#allocation3 + $0x51] sm:$0xff]  ;;  %v5955_v47 = vld [vmem:[%s7380_s3 + $0x68] sm:$0xff]   ;;  %v3004_v61 = vpack.c.bf16 %v2991_v23, %v2990_v50 }
 0x30b   : > { %v4168_v44 = vpack.c.bf16 %v7068_v51, %v7066_v62  ;;  %2630 = vst.msk [vmem:[#allocation3 + $0x78] sm:$0xff] %vm290_vm3, %v2614_v57  ;;  %v2671_v28 = vld [vmem:[#allocation3 + $0x41] sm:$0xff]  ;;  %v2672_v60 = vld [vmem:[#allocation3 + $0x49] sm:$0xff]  ;;  %v7083_v19 = vld [vmem:[#allocation3 + $0x58] sm:$0xff] }
 0x30c   : > { %v7076_v46 = vld [vmem:[#allocation3 + $0x48] sm:$0xff]  ;;  %2628 = vst.msk [vmem:[#allocation3 + $0x68] sm:$0xff] %vm290_vm3, %v2612_v53  ;;  %5450 = vmatmul.mubr.msk.bf16.gmra.mrb[116].mxu0 %vm290_vm3, %v2682_v16  ;;  %v2683_v5 = vpack.c.bf16 %v2672_v60, %v2671_v28  ;;  %v2652_v27 = vpack.c.bf16 %v7083_v19, %v7071_v18  ;;  %v2988_v37 = vld [vmem:[#allocation3 + $0x12] sm:$0xff]  ;;  %v2993_v52 = vld [vmem:[#allocation3 + $0x3a] sm:$0xff] }
 0x30d   : > { %v4169_v15 = vpack.c.bf16 %v7071_v18, %v7076_v46  ;;  %v2651_v32 = vpack.c.bf16 %v7076_v46, %v7068_v51  ;;  %v3003_v63 = vpack.c.bf16 %v2989_v6, %v2988_v37  ;;  %v5956_v57 = vld [vmem:[%s7380_s3 + $0x70] sm:$0xff]   ;;  %v2994_v53 = vld [vmem:[#allocation3 + $0x42] sm:$0xff] }
 0x30e   : > { %5453 = vmatprep.mubr.msk.bf16.mxu1 %vm290_vm3, %v2683_v5  ;;  %v2995_v16 = vld [vmem:[#allocation3 + $0x4a] sm:$0xff]  ;;  %v2992_v28 = vld [vmem:[#allocation3 + $0x32] sm:$0xff] }
 0x30f   : > { %v3005_v60 = vpack.c.bf16 %v2993_v52, %v2992_v28  ;;  %v5957_v5 = vld [vmem:[%s7380_s3 + $0x78] sm:$0xff]   ;;  %v3377_v28 = vld [vmem:[#allocation3 + $0x24] sm:$0xff] }
 0x310   : > { %v7090_v9 = vld [vmem:[#allocation3 + $0x70] sm:$0xff]  ;;  %v4164_v26 = vld [vmem:[#allocation3 + $0x88] sm:$0xff] }
 0x311   : > { %v2674_v54 = vld [vmem:[#allocation3 + $0x59] sm:$0xff] }
 0x312   : > { %v7085_v33 = vld [vmem:[#allocation3 + $0x60] sm:$0xff]  ;;  %v2684_v7 = vpack.c.bf16 %v2674_v54, %v2673_v10  ;;  %v2677_v35 = vld [vmem:[#allocation3 + $0x71] sm:$0xff]  ;;  %v3006_v10 = vpack.c.bf16 %v2995_v16, %v2994_v53 }
 0x313   : > { %v4170_v45 = vpack.c.bf16 %v7085_v33, %v7083_v19  ;;  %v2675_v1 = vld [vmem:[#allocation3 + $0x61] sm:$0xff]  ;;  %v2676_v59 = vld [vmem:[#allocation3 + $0x69] sm:$0xff]  ;;  %v2678_v21 = vld [vmem:[#allocation3 + $0x79] sm:$0xff] }
 0x314   : > { %v7094_v58 = vld [vmem:[#allocation3 + $0x68] sm:$0xff]  ;;  %5454 = vmatmul.mubr.msk.bf16.vlgmr.msra.gmra.mrb[32].mxu1 %vm290_vm3, %v2684_v7  ;;  %v2685_v13 = vpack.c.bf16 %v2676_v59, %v2675_v1  ;;  %v2686_v12 = vpack.c.bf16 %v2678_v21, %v2677_v35  ;;  %v7141_v29 = vld [vmem:[#allocation3 + $0x78] sm:$0xff]  ;;  %v5958_v54 = vld [vmem:[%s7380_s3 + $0x80] sm:$0xff]  }
 0x315   : > { %v4171_v34 = vpack.c.bf16 %v7090_v9, %v7094_v58  ;;  %5462 = vmatpush3.bf16.msra.mxu1 %v7014_v56  ;;  %v5950_v56 = vld [vmem:[%s7380_s3 + $0x40] sm:$0xff]   ;;  %v2653_v2 = vpack.c.bf16 %v7094_v58, %v7085_v33  ;;  %v2654_v11 = vpack.c.bf16 %v7141_v29, %v7090_v9  ;;  %v2999_v1 = vld [vmem:[#allocation3 + $0x6a] sm:$0xff]  ;;  %v2996_v59 = vld [vmem:[#allocation3 + $0x52] sm:$0xff]  ;;  %v4172_v17 = vpack.c.bf16 %v4163_v43, %v7141_v29 }
 0x316   : > { %5457 = vmatprep.mubr.msk.bf16.mxu1 %vm290_vm3, %v2685_v13  ;;  %5463 = vmatprep.subr.bf16.mxu1 %v5947_v41  ;;  %v2997_v7 = vld [vmem:[#allocation3 + $0x5a] sm:$0xff]  ;;  %v3000_v35 = vld [vmem:[#allocation3 + $0x72] sm:$0xff] }
 0x317   : > { %v3007_v13 = vpack.c.bf16 %v2997_v7, %v2996_v59  ;;  %v3001_v21 = vld [vmem:[#allocation3 + $0x7a] sm:$0xff]  ;;  %v3192_v6 = vld [vmem:[#allocation3 + $0x6b] sm:$0xff] }
 0x318   : > { %v3009_v14 = vpack.c.bf16 %v3001_v21, %v3000_v35  ;;  %v3193_v50 = vld [vmem:[#allocation3 + $0x73] sm:$0xff]  ;;  %v3190_v23 = vld [vmem:[#allocation3 + $0x5b] sm:$0xff]  ;;  %v5963_v7 = vld [vmem:[%s7380_s3 + $0xa8] sm:$0xff]  }
 0x319   : > { %5464 = vmatpush3.bf16.msra.mxu1 %v5947_v41  ;;  %v2998_v41 = vld [vmem:[#allocation3 + $0x62] sm:$0xff]  ;;  %v3375_v52 = vld [vmem:[#allocation3 + $0x14] sm:$0xff] }
 0x31a   : > { %5465 = vmatprep.subr.bf16.mxu1 %v5948_v40  ;;  %v3381_v59 = vld [vmem:[#allocation3 + $0x44] sm:$0xff]  ;;  %v3380_v35 = vld [vmem:[#allocation3 + $0x3c] sm:$0xff] }
 0x31b   : > { %v3393_v21 = vpack.c.bf16 %v3381_v59, %v3380_v35  ;;  %v3764_v35 = vld [vmem:[#allocation3 + $0x26] sm:$0xff] }
 0x31c   : > { %5458 = vmatmul.mubr.msk.bf16.gmra.mrb[36].mxu1 %vm290_vm3, %v2686_v12  ;;  %v3181_v12 = vld [vmem:[#allocation3 + $0x13] sm:$0xff] }
 0x31d   : > { %5466 = vmatpush3.bf16.msra.mxu1 %v5948_v40  ;;  %5469 = vmatprep.mubr.msk.bf16.mxu1 %vm290_vm3, %v2647_v24  ;;  %v3008_v40 = vpack.c.bf16 %v2999_v1, %v2998_v41  ;;  %v3183_v24 = vld [vmem:[#allocation3 + $0x23] sm:$0xff]  ;;  %v5964_v1 = vld [vmem:[%s7380_s3 + $0xb0] sm:$0xff]  }
 0x31e   : > { %5467 = vmatprep.subr.bf16.mxu1 %v5949_v31 }
 0x321   : > { %5468 = vmatpush3.bf16.msra.mxu1 %v5949_v31  ;;  %v3196_v31 = vpack.c.bf16 %v3181_v12, %v3180_v38  ;;  %v5965_v38 = vld [vmem:[%s7380_s3 + $0xb8] sm:$0xff]  }
 0x322   : > { %5485 = vmatprep.subr.bf16.mxu1 %v5950_v56 }
 0x324   : > { %5470 = vmatmul.mubr.msk.bf16.vlgmr.msra.gmra.mrb[40].mxu1 %vm290_vm3, %v2648_v48  ;;  %v3182_v48 = vld [vmem:[#allocation3 + $0x1b] sm:$0xff] }
 0x325   : > { %5473 = vmatprep.mubr.msk.bf16.mxu1 %vm290_vm3, %v2649_v25  ;;  %5486 = vmatpush3.bf16.msra.mxu1 %v5950_v56  ;;  %v3184_v56 = vld [vmem:[#allocation3 + $0x2b] sm:$0xff] }
 0x326   : > { %5487 = vmatprep.subr.bf16.mxu1 %v5951_v20  ;;  %v5959_v25 = vld [vmem:[%s7380_s3 + $0x88] sm:$0xff]  }
 0x329   : > { %5488 = vmatpush3.bf16.msra.mxu1 %v5951_v20  ;;  %v3197_v20 = vpack.c.bf16 %v3183_v24, %v3182_v48  ;;  %v3386_v24 = vld [vmem:[#allocation3 + $0x6c] sm:$0xff] }
 0x32a   : > { %5489 = vmatprep.subr.bf16.mxu1 %v5952_v36 }
 0x32c   : > { %5474 = vmatmul.mubr.msk.bf16.gmra.mrb[44].mxu1 %vm290_vm3, %v2650_v4  ;;  %v5960_v4 = vld [vmem:[%s7380_s3 + $0x90] sm:$0xff]  }
 0x32d   : > { %5477 = vmatprep.mubr.msk.bf16.mxu1 %vm290_vm3, %v2651_v32  ;;  %5490 = vmatpush3.bf16.msra.mxu1 %v5952_v36  ;;  %v3198_v36 = vpack.c.bf16 %v3185_v42, %v3184_v56  ;;  %v3188_v32 = vld [vmem:[#allocation3 + $0x4b] sm:$0xff]  ;;  %v3387_v56 = vld [vmem:[#allocation3 + $0x74] sm:$0xff]  ;;  %v3384_v42 = vld [vmem:[#allocation3 + $0x5c] sm:$0xff] }
 0x32e   : > { %5491 = vmatprep.subr.bf16.mxu1 %v5953_v8 }
 0x331   : > { %5492 = vmatpush3.bf16.msra.mxu1 %v5953_v8  ;;  %v3187_v8 = vld [vmem:[#allocation3 + $0x43] sm:$0xff] }
 0x332   : > { %5509 = vmatprep.subr.bf16.mxu1 %v5954_v0 }
 0x334   : > { %5478 = vmatmul.mubr.msk.bf16.gmra.mrb[32].mxu1 %vm290_vm3, %v2652_v27  ;;  %v3186_v27 = vld [vmem:[#allocation3 + $0x3b] sm:$0xff] }
 0x335   : > { %5481 = vmatprep.mubr.msk.bf16.mxu1 %vm290_vm3, %v2653_v2  ;;  %v3199_v2 = vpack.c.bf16 %v3187_v8, %v3186_v27  ;;  %v3569_v8 = vld [vmem:[#allocation3 + $0x15] sm:$0xff]  ;;  %v3571_v27 = vld [vmem:[#allocation3 + $0x25] sm:$0xff] }
 0x33c   : > { %5482 = vmatmul.mubr.msk.bf16.gmra.mrb[36].mxu1 %vm290_vm3, %v2654_v11  ;;  %v5962_v11 = vld [vmem:[%s7380_s3 + $0xa0] sm:$0xff]  }
 0x33d   : > { %5493 = vmatprep.mubr.msk.bf16.mxu1 %vm290_vm3, %v3002_v30  ;;  %v3191_v30 = vld [vmem:[#allocation3 + $0x63] sm:$0xff] }
 0x33e   : > { %v3201_v37 = vpack.c.bf16 %v3191_v30, %v3190_v23  ;;  %v5967_v30 = vld [vmem:[%s7380_s3 + $0xc8] sm:$0xff]  }
 0x33f   : > { %v3575_v23 = vld [vmem:[#allocation3 + $0x45] sm:$0xff] }
 0x344   : > { %5494 = vmatmul.mubr.msk.bf16.vlgmr.msra.gmra.mrb[40].mxu1 %vm290_vm3, %v3003_v63  ;;  %v3202_v63 = vpack.c.bf16 %v3193_v50, %v3192_v6  ;;  %v5968_v50 = vld [vmem:[%s7380_s3 + $0xd0] sm:$0xff]  }
 0x345   : > { %5497 = vmatprep.mubr.msk.bf16.mxu1 %vm290_vm3, %v3004_v61  ;;  %5510 = vmatpush3.bf16.msra.mxu1 %v5954_v0  ;;  %v3189_v0 = vld [vmem:[#allocation3 + $0x53] sm:$0xff]  ;;  %v3195_v61 = vld [vmem:[#allocation3 + $0x83] sm:$0xff] }
 0x346   : > { %5511 = vmatprep.subr.bf16.mxu1 %v5955_v47  ;;  %v3200_v55 = vpack.c.bf16 %v3189_v0, %v3188_v32 }
 0x349   : > { %5512 = vmatpush3.bf16.msra.mxu1 %v5955_v47  ;;  %v3194_v47 = vld [vmem:[#allocation3 + $0x7b] sm:$0xff] }
 0x34a   : > { %5513 = vmatprep.subr.bf16.mxu1 %v5956_v57  ;;  %v3203_v53 = vpack.c.bf16 %v3195_v61, %v3194_v47  ;;  %v3574_v47 = vld [vmem:[#allocation3 + $0x3d] sm:$0xff] }
 0x34b   : > { %v3587_v61 = vpack.c.bf16 %v3575_v23, %v3574_v47 }
 0x34c   : > { %5498 = vmatmul.mubr.msk.bf16.gmra.mrb[44].mxu1 %vm290_vm3, %v3005_v60  ;;  %v3378_v60 = vld [vmem:[#allocation3 + $0x2c] sm:$0xff] }
 0x34d   : > { %5501 = vmatprep.mubr.msk.bf16.mxu1 %vm290_vm3, %v3006_v10  ;;  %5514 = vmatpush3.bf16.msra.mxu1 %v5956_v57  ;;  %v3374_v57 = vld [vmem:[#allocation3 + $0xc] sm:$0xff]  ;;  %v3376_v10 = vld [vmem:[#allocation3 + $0x1c] sm:$0xff] }
 0x34e   : > { %5515 = vmatprep.subr.bf16.mxu1 %v5957_v5  ;;  %v3390_v16 = vpack.c.bf16 %v3375_v52, %v3374_v57  ;;  %v5969_v57 = vld [vmem:[%s7380_s3 + $0xd8] sm:$0xff]  }
 0x351   : > { %5516 = vmatpush3.bf16.msra.mxu1 %v5957_v5  ;;  %v3379_v5 = vld [vmem:[#allocation3 + $0x34] sm:$0xff] }
 0x352   : > { %5533 = vmatprep.subr.bf16.mxu1 %v5958_v54  ;;  %v3392_v41 = vpack.c.bf16 %v3379_v5, %v3378_v60  ;;  %v3581_v60 = vld [vmem:[#allocation3 + $0x75] sm:$0xff]  ;;  %v3578_v5 = vld [vmem:[#allocation3 + $0x5d] sm:$0xff] }
 0x354   : > { %5502 = vmatmul.mubr.msk.bf16.gmra.mrb[32].mxu1 %vm290_vm3, %v3007_v13  ;;  %v3382_v13 = vld [vmem:[#allocation3 + $0x4c] sm:$0xff] }
 0x355   : > { %5505 = vmatprep.mubr.msk.bf16.mxu1 %vm290_vm3, %v3008_v40  ;;  %v3383_v40 = vld [vmem:[#allocation3 + $0x54] sm:$0xff] }
 0x356   : > { %v3394_v12 = vpack.c.bf16 %v3383_v40, %v3382_v13  ;;  %v3762_v13 = vld [vmem:[#allocation3 + $0x16] sm:$0xff] }
 0x35c   : > { %5506 = vmatmul.mubr.msk.bf16.gmra.mrb[36].mxu1 %vm290_vm3, %v3009_v14  ;;  %v5966_v14 = vld [vmem:[%s7380_s3 + $0xc0] sm:$0xff]  }
 0x35d   : > { %5517 = vmatprep.mubr.msk.bf16.mxu1 %vm290_vm3, %v3196_v31  ;;  %v3385_v31 = vld [vmem:[#allocation3 + $0x64] sm:$0xff] }
 0x35e   : > { %v3395_v48 = vpack.c.bf16 %v3385_v31, %v3384_v42  ;;  %v5971_v31 = vld [vmem:[%s7380_s3 + $0xe8] sm:$0xff]  }
 0x35f   : > { %v3768_v42 = vld [vmem:[#allocation3 + $0x46] sm:$0xff] }
 0x364   : > { %5518 = vmatmul.mubr.msk.bf16.vlgmr.msra.gmra.mrb[40].mxu1 %vm290_vm3, %v3197_v20  ;;  %v3396_v20 = vpack.c.bf16 %v3387_v56, %v3386_v24  ;;  %v5972_v56 = vld [vmem:[%s7380_s3 + $0xf0] sm:$0xff]  }
 0x365   : > { %5521 = vmatprep.mubr.msk.bf16.mxu1 %vm290_vm3, %v3198_v36  ;;  %5534 = vmatpush3.bf16.msra.mxu1 %v5958_v54  ;;  %v3391_v54 = vpack.c.bf16 %v3377_v28, %v3376_v10  ;;  %v3389_v36 = vld [vmem:[#allocation3 + $0x84] sm:$0xff]  ;;  %v3580_v28 = vld [vmem:[#allocation3 + $0x6d] sm:$0xff] }
 0x366   : > { %5535 = vmatprep.subr.bf16.mxu1 %v5959_v25 }
 0x369   : > { %5536 = vmatpush3.bf16.msra.mxu1 %v5959_v25  ;;  %v3388_v25 = vld [vmem:[#allocation3 + $0x7c] sm:$0xff] }
 0x36a   : > { %5537 = vmatprep.subr.bf16.mxu1 %v5960_v4  ;;  %v3397_v32 = vpack.c.bf16 %v3389_v36, %v3388_v25  ;;  %v3770_v36 = vld [vmem:[#allocation3 + $0x56] sm:$0xff] }
 0x36c   : > { %5522 = vmatmul.mubr.msk.bf16.gmra.mrb[44].mxu1 %vm290_vm3, %v3199_v2  ;;  %v3572_v2 = vld [vmem:[#allocation3 + $0x2d] sm:$0xff] }
 0x36d   : > { %5525 = vmatprep.mubr.msk.bf16.mxu1 %vm290_vm3, %v3200_v55  ;;  %5538 = vmatpush3.bf16.msra.mxu1 %v5960_v4  ;;  %v3568_v4 = vld [vmem:[#allocation3 + $0xd] sm:$0xff]  ;;  %v3570_v55 = vld [vmem:[#allocation3 + $0x1d] sm:$0xff] }
 0x36e   : > { %5539 = vmatprep.subr.bf16.mxu1 %v5961_v49  ;;  %v3584_v0 = vpack.c.bf16 %v3569_v8, %v3568_v4  ;;  %v5973_v4 = vld [vmem:[%s7380_s3 + $0xf8] sm:$0xff]  }
 0x371   : > { %5540 = vmatpush3.bf16.msra.mxu1 %v5961_v49  ;;  %v3573_v49 = vld [vmem:[#allocation3 + $0x35] sm:$0xff] }
 0x372   : > { %5557 = vmatprep.subr.bf16.mxu1 %v5962_v11  ;;  %v3586_v6 = vpack.c.bf16 %v3573_v49, %v3572_v2  ;;  %v3774_v2 = vld [vmem:[#allocation3 + $0x76] sm:$0xff]  ;;  %v3775_v49 = vld [vmem:[#allocation3 + $0x7e] sm:$0xff] }
 0x374   : > { %5526 = vmatmul.mubr.msk.bf16.gmra.mrb[32].mxu1 %vm290_vm3, %v3201_v37  ;;  %v3576_v37 = vld [vmem:[#allocation3 + $0x4d] sm:$0xff] }
 0x375   : > { %5529 = vmatprep.mubr.msk.bf16.mxu1 %vm290_vm3, %v3202_v63  ;;  %v3577_v63 = vld [vmem:[#allocation3 + $0x55] sm:$0xff] }
 0x376   : > { %v3588_v52 = vpack.c.bf16 %v3577_v63, %v3576_v37  ;;  %v3957_v63 = vld [vmem:[#allocation3 + $0x1f] sm:$0xff] }
 0x37c   : > { %5530 = vmatmul.mubr.msk.bf16.gmra.mrb[36].mxu1 %vm290_vm3, %v3203_v53  ;;  %v5970_v53 = vld [vmem:[%s7380_s3 + $0xe0] sm:$0xff]  }
 0x37d   : > { %5541 = vmatprep.mubr.msk.bf16.mxu1 %vm290_vm3, %v3390_v16  ;;  %v3579_v16 = vld [vmem:[#allocation3 + $0x65] sm:$0xff] }
 0x37e   : > { %v3589_v10 = vpack.c.bf16 %v3579_v16, %v3578_v5  ;;  %v3958_v16 = vld [vmem:[#allocation3 + $0x27] sm:$0xff]  ;;  %v3961_v5 = vld [vmem:[#allocation3 + $0x3f] sm:$0xff] }
 0x384   : > { %5542 = vmatmul.mubr.msk.bf16.vlgmr.msra.gmra.mrb[40].mxu1 %vm290_vm3, %v3391_v54  ;;  %v3590_v54 = vpack.c.bf16 %v3581_v60, %v3580_v28  ;;  %v3959_v28 = vld [vmem:[#allocation3 + $0x2f] sm:$0xff] }
 0x385   : > { %5545 = vmatprep.mubr.msk.bf16.mxu1 %vm290_vm3, %v3392_v41  ;;  %5558 = vmatpush3.bf16.msra.mxu1 %v5962_v11  ;;  %v3585_v11 = vpack.c.bf16 %v3571_v27, %v3570_v55  ;;  %v3583_v41 = vld [vmem:[#allocation3 + $0x85] sm:$0xff]  ;;  %v3773_v27 = vld [vmem:[#allocation3 + $0x6e] sm:$0xff] }
 0x386   : > { %5559 = vmatprep.subr.bf16.mxu1 %v5963_v7 }
 0x389   : > { %5560 = vmatpush3.bf16.msra.mxu1 %v5963_v7  ;;  %v3582_v7 = vld [vmem:[#allocation3 + $0x7d] sm:$0xff] }
 0x38a   : > { %5561 = vmatprep.subr.bf16.mxu1 %v5964_v1  ;;  %v3591_v59 = vpack.c.bf16 %v3583_v41, %v3582_v7  ;;  %v3973_v7 = vpack.c.bf16 %v3959_v28, %v3958_v16  ;;  %v3960_v41 = vld [vmem:[#allocation3 + $0x37] sm:$0xff] }
 0x38c   : > { %5546 = vmatmul.mubr.msk.bf16.gmra.mrb[44].mxu1 %vm290_vm3, %v3393_v21  ;;  %v3765_v21 = vld [vmem:[#allocation3 + $0x2e] sm:$0xff] }
 0x38d   : > { %5549 = vmatprep.mubr.msk.bf16.mxu1 %vm290_vm3, %v3394_v12  ;;  %5562 = vmatpush3.bf16.msra.mxu1 %v5964_v1  ;;  %v3763_v1 = vld [vmem:[#allocation3 + $0x1e] sm:$0xff]  ;;  %v3779_v12 = vpack.c.bf16 %v3765_v21, %v3764_v35  ;;  %v3963_v35 = vld [vmem:[#allocation3 + $0x4f] sm:$0xff] }
 0x38e   : > { %5563 = vmatprep.subr.bf16.mxu1 %v5965_v38  ;;  %v3778_v40 = vpack.c.bf16 %v3763_v1, %v3762_v13  ;;  %v5975_v1 = vld [vmem:[%s7380_s3 + $0x108] sm:$0xff]   ;;  %v5976_v13 = vld [vmem:[%s7380_s3 + $0x110] sm:$0xff]   ;;  %v3965_v21 = vld [vmem:[#allocation3 + $0x5f] sm:$0xff] }
 0x391   : > { %5564 = vmatpush3.bf16.msra.mxu1 %v5965_v38  ;;  %v3767_v38 = vld [vmem:[#allocation3 + $0x3e] sm:$0xff] }
 0x392   : > { %5581 = vmatprep.subr.bf16.mxu1 %v5966_v14 }
 0x394   : > { %5550 = vmatmul.mubr.msk.bf16.gmra.mrb[32].mxu1 %vm290_vm3, %v3395_v48  ;;  %v3769_v48 = vld [vmem:[#allocation3 + $0x4e] sm:$0xff] }
 0x395   : > { %5553 = vmatprep.mubr.msk.bf16.mxu1 %vm290_vm3, %v3396_v20  ;;  %v3771_v20 = vld [vmem:[#allocation3 + $0x5e] sm:$0xff]  ;;  %v3781_v25 = vpack.c.bf16 %v3769_v48, %v3768_v42 }
 0x396   : > { %v3782_v8 = vpack.c.bf16 %v3771_v20, %v3770_v36  ;;  %v3968_v42 = vld [vmem:[#allocation3 + $0x77] sm:$0xff]  ;;  %v3969_v48 = vld [vmem:[#allocation3 + $0x7f] sm:$0xff]  ;;  %v3970_v36 = vld [vmem:[#allocation3 + $0x87] sm:$0xff] }
 0x39c   : > { %5554 = vmatmul.mubr.msk.bf16.gmra.mrb[36].mxu1 %vm290_vm3, %v3397_v32  ;;  %v5974_v32 = vld [vmem:[%s7380_s3 + $0x100] sm:$0xff]  }
 0x39d   : > { %5565 = vmatprep.mubr.msk.bf16.mxu1 %vm290_vm3, %v3584_v0  ;;  %v3772_v0 = vld [vmem:[#allocation3 + $0x66] sm:$0xff] }
 0x39e   : > { %v3783_v55 = vpack.c.bf16 %v3773_v27, %v3772_v0 }
 0x3a4   : > { %5566 = vmatmul.mubr.msk.bf16.vlgmr.msra.gmra.mrb[40].mxu1 %vm290_vm3, %v3585_v11  ;;  %v3784_v11 = vpack.c.bf16 %v3775_v49, %v3774_v2 }
 0x3a5   : > { %5569 = vmatprep.mubr.msk.bf16.mxu1 %vm290_vm3, %v3586_v6  ;;  %5582 = vmatpush3.bf16.msra.mxu1 %v5966_v14  ;;  %v3766_v14 = vld [vmem:[#allocation3 + $0x36] sm:$0xff]  ;;  %v3777_v6 = vld [vmem:[#allocation3 + $0x8e] sm:$0xff] }
 0x3a6   : > { %5583 = vmatprep.subr.bf16.mxu1 %v5967_v30  ;;  %v3780_v24 = vpack.c.bf16 %v3767_v38, %v3766_v14  ;;  %v5977_v14 = vld [vmem:[%s7380_s3 + $0x118] sm:$0xff]  }
 0x3a9   : > { %5584 = vmatpush3.bf16.msra.mxu1 %v5967_v30  ;;  %v3776_v30 = vld [vmem:[#allocation3 + $0x86] sm:$0xff] }
 0x3aa   : > { %5585 = vmatprep.subr.bf16.mxu1 %v5968_v50  ;;  %v3785_v37 = vpack.c.bf16 %v3777_v6, %v3776_v30 }
 0x3ac   : > { %5570 = vmatmul.mubr.msk.bf16.gmra.mrb[44].mxu1 %vm290_vm3, %v3587_v61 }
 0x3ad   : > { %5573 = vmatprep.mubr.msk.bf16.mxu1 %vm290_vm3, %v3588_v52  ;;  %5586 = vmatpush3.bf16.msra.mxu1 %v5968_v50 }
 0x3ae   : > { %5587 = vmatprep.subr.bf16.mxu1 %v5969_v57 }
 0x3b1   : > { %5588 = vmatpush3.bf16.msra.mxu1 %v5969_v57  ;;  %v3956_v57 = vld [vmem:[#allocation3 + $0x17] sm:$0xff] }
 0x3b2   : > { %5605 = vmatprep.subr.bf16.mxu1 %v5970_v53  ;;  %v3972_v52 = vpack.c.bf16 %v3957_v63, %v3956_v57 }
 0x3b4   : > { %5574 = vmatmul.mubr.msk.bf16.gmra.mrb[32].mxu1 %vm290_vm3, %v3589_v10 }
 0x3b5   : > { %5577 = vmatprep.mubr.msk.bf16.mxu1 %vm290_vm3, %v3590_v54 }
 0x3bc   : > { %5578 = vmatmul.mubr.msk.bf16.gmra.mrb[36].mxu1 %vm290_vm3, %v3591_v59  ;;  %v3974_v59 = vpack.c.bf16 %v3961_v5, %v3960_v41 }
 0x3bd   : > { %5589 = vmatprep.mubr.msk.bf16.mxu1 %vm290_vm3, %v3778_v40  ;;  %v3962_v40 = vld [vmem:[#allocation3 + $0x47] sm:$0xff] }
 0x3be   : > { %v3975_v38 = vpack.c.bf16 %v3963_v35, %v3962_v40 }
 0x3c4   : > { %5590 = vmatmul.mubr.msk.bf16.vlgmr.msra.gmra.mrb[40].mxu1 %vm290_vm3, %v3779_v12  ;;  %v3964_v12 = vld [vmem:[#allocation3 + $0x57] sm:$0xff] }
 0x3c5   : > { %5593 = vmatprep.mubr.msk.bf16.mxu1 %vm290_vm3, %v3780_v24  ;;  %5606 = vmatpush3.bf16.msra.mxu1 %v5970_v53  ;;  %v3966_v24 = vld [vmem:[#allocation3 + $0x67] sm:$0xff] }
 0x3c6   : > { %5607 = vmatprep.subr.bf16.mxu1 %v5971_v31 }
 0x3c9   : > { %5608 = vmatpush3.bf16.msra.mxu1 %v5971_v31  ;;  %v3976_v31 = vpack.c.bf16 %v3965_v21, %v3964_v12 }
 0x3ca   : > { %5609 = vmatprep.subr.bf16.mxu1 %v5972_v56 }
 0x3cc   : > { %5594 = vmatmul.mubr.msk.bf16.gmra.mrb[44].mxu1 %vm290_vm3, %v3781_v25  ;;  %v3978_v25 = vpack.c.bf16 %v3969_v48, %v3968_v42 }
 0x3cd   : > { %5597 = vmatprep.mubr.msk.bf16.mxu1 %vm290_vm3, %v3782_v8  ;;  %5610 = vmatpush3.bf16.msra.mxu1 %v5972_v56  ;;  %v3967_v56 = vld [vmem:[#allocation3 + $0x6f] sm:$0xff] }
 0x3ce   : > { %5611 = vmatprep.subr.bf16.mxu1 %v5973_v4  ;;  %v3977_v20 = vpack.c.bf16 %v3967_v56, %v3966_v24 }
 0x3d1   : > { %5612 = vmatpush3.bf16.msra.mxu1 %v5973_v4  ;;  %v3971_v4 = vld [vmem:[#allocation3 + $0x8f] sm:$0xff] }
 0x3d2   : > { %5629 = vmatprep.subr.bf16.mxu1 %v5974_v32  ;;  %v3979_v8 = vpack.c.bf16 %v3971_v4, %v3970_v36 }
 0x3d4   : > { %5598 = vmatmul.mubr.msk.bf16.gmra.mrb[32].mxu1 %vm290_vm3, %v3783_v55 }
 0x3d5   : > { %5601 = vmatprep.mubr.msk.bf16.mxu1 %vm290_vm3, %v3784_v11 }
 0x3d7   : > { %v7245_v50 = vpop.f32.mrb[112].mxu0 }
 0x3d8   : > { %v7247_v23 = vpop.f32.mrb[113].mxu0 }
 0x3d9   : > { %v7249_v47 = vpop.f32.mrb[114].mxu0 }
 0x3da   : > { %v7251_v61 = vpop.f32.mrb[115].mxu0 }
 0x3dc   : > { %5602 = vmatmul.mubr.msk.bf16.gmra.mrb[36].mxu1 %vm290_vm3, %v3785_v37 }
 0x3dd   : > { %5613 = vmatprep.mubr.msk.bf16.mxu1 %vm290_vm3, %v3972_v52 }
 0x3df   : > { %v7255_v53 = vpop.f32.mrb[116].mxu0 }
 0x3e0   : > { %v7257_v60 = vpop.f32.mrb[117].mxu0 }
 0x3e1   : > { %v7259_v10 = vpop.f32.mrb[118].mxu0 }
 0x3e2   : > { %v7261_v54 = vpop.f32.mrb[119].mxu0 }
 0x3e4   : > { %5614 = vmatmul.mubr.msk.bf16.vlgmr.msra.gmra.mrb[40].mxu1 %vm290_vm3, %v3973_v7 }
 0x3e5   : > { %5617 = vmatprep.mubr.msk.bf16.mxu1 %vm290_vm3, %v3974_v59  ;;  %5630 = vmatpush3.bf16.msra.mxu1 %v5974_v32 }
 0x3e6   : > { %5631 = vmatprep.subr.bf16.mxu1 %v5975_v1 }
 0x3e9   : > { %5632 = vmatpush3.bf16.msra.mxu1 %v5975_v1 }
 0x3ea   : > { %5633 = vmatprep.subr.bf16.mxu1 %v5976_v13 }
 0x3ec   : > { %5618 = vmatmul.mubr.msk.bf16.gmra.mrb[44].mxu1 %vm290_vm3, %v3975_v38 }
 0x3ed   : > { %5621 = vmatprep.mubr.msk.bf16.mxu1 %vm290_vm3, %v3976_v31  ;;  %5634 = vmatpush3.bf16.msra.mxu1 %v5976_v13 }
 0x3ee   : > { %5635 = vmatprep.subr.bf16.mxu1 %v5977_v14 }
 0x3f1   : > { %5636 = vmatpush3.bf16.msra.mxu1 %v5977_v14 }
 0x3f4   : > { %5622 = vmatmul.mubr.msk.bf16.gmra.mrb[32].mxu1 %vm290_vm3, %v3977_v20 }
 0x3f5   : > { %5625 = vmatprep.mubr.msk.bf16.mxu1 %vm290_vm3, %v3978_v25 }
 0x3fc   : > { %5626 = vmatmul.mubr.msk.bf16.gmra.mrb[36].mxu1 %vm290_vm3, %v3979_v8 }
 0x3fd   : > { %5637 = vmatprep.mubr.msk.bf16.mxu1 %vm290_vm3, %v4166_v22  ;;  %v4165_v22 = vld [vmem:[#allocation3 + $0x90] sm:$0xff] }
 0x3fe   : > { %v4173_v3 = vpack.c.bf16 %v4165_v22, %v4164_v26 }
 0x404   : > { %5638 = vmatmul.mubr.msk.bf16.vlgmr.msra.gmra.mrb[40].mxu1 %vm290_vm3, %v4167_v39  ;;  %v7311_v39 = vld [vmem:[%s7383_s6] ss:$0 sm:$0xff] }
 0x405   : > { %5641 = vmatprep.mubr.msk.bf16.mxu1 %vm290_vm3, %v4168_v44 }
 0x40c   : > { %5642 = vmatmul.mubr.msk.bf16.gmra.mrb[44].mxu1 %vm290_vm3, %v4169_v15 }
 0x40d   : > { %5645 = vmatprep.mubr.msk.bf16.mxu1 %vm290_vm3, %v4170_v45 }
 0x414   : > { %5646 = vmatmul.mubr.msk.bf16.gmra.mrb[32].mxu1 %vm290_vm3, %v4171_v34 }
 0x415   : > { %5649 = vmatprep.mubr.msk.bf16.mxu1 %vm290_vm3, %v4172_v17 }
 0x41c   : > { %5650 = vmatmul.mubr.msk.bf16.gmra.mrb[36].mxu1 %vm290_vm3, %v4173_v3 }
 0x4d7   : > { %v5639_v62 = vpop.f32.mrb[40].mxu1 }
 0x4d8   : > { %v5661_v51 = vadd.f32 %v5639_v62, %v7245_v50  ;;  %v4265_v18 = vpop.f32.mrb[41].mxu1 }
 0x4d9   : > { %v5662_v44 = vadd.f32 %v4265_v18, %v7247_v23  ;;  %v5640_v46 = vpop.f32.mrb[42].mxu1 }
 0x4da   : > { %v4352_v15 = vadd.f32 %v5661_v51, %v7311_v39  ;;  %v5663_v19 = vadd.f32 %v5640_v46, %v7249_v47  ;;  %v4268_v33 = vpop.f32.mrb[43].mxu1 }
 0x4db   : > { %v4350_v9 = vadd.f32 %v5662_v44, %v7311_v39  ;;  %v5664_v45 = vadd.f32 %v4268_v33, %v7251_v61 }
 0x4dc   : > { %v4368_v58 = vmax.f32 %v4352_v15, 0.0  ;;  %v4353_v34 = vadd.f32 %v5663_v19, %v7311_v39 }
 0x4dd   : > { %v4366_v29 = vmax.f32 %v4350_v9, 0.0  ;;  %v4351_v32 = vadd.f32 %v5664_v45, %v7311_v39 }
 0x4de   : > { %4384 = vst.msk [vmem:[%s7320_s13 + $0x10] sm:$0xff] %vm290_vm3, %v4368_v58  ;;  %v4369_v0 = vmax.f32 %v4353_v34, 0.0 }
 0x4df   : > { %4382 = vst.msk [vmem:[%s7320_s13] sm:$0xff] %vm290_vm3, %v4366_v29  ;;  %v4367_v27 = vmax.f32 %v4351_v32, 0.0  ;;  %v5643_v2 = vpop.f32.mrb[44].mxu1 }
 0x4e0   : > { %4385 = vst.msk [vmem:[%s7320_s13 + $0x18] sm:$0xff] %vm290_vm3, %v4369_v0  ;;  %v5665_v49 = vadd.f32 %v5643_v2, %v7255_v53  ;;  %v4281_v55 = vpop.f32.mrb[45].mxu1 }
 0x4e1   : > { %4383 = vst.msk [vmem:[%s7320_s13 + $0x8] sm:$0xff] %vm290_vm3, %v4367_v27  ;;  %v5666_v11 = vadd.f32 %v4281_v55, %v7257_v60  ;;  %v5644_v30 = vpop.f32.mrb[46].mxu1 }
 0x4e2   : > { %v4356_v6 = vadd.f32 %v5665_v49, %v7311_v39  ;;  %v5667_v50 = vadd.f32 %v5644_v30, %v7259_v10  ;;  %v4284_v23 = vpop.f32.mrb[47].mxu1 }
 0x4e3   : > { %v4354_v37 = vadd.f32 %v5666_v11, %v7311_v39  ;;  %v5668_v63 = vadd.f32 %v4284_v23, %v7261_v54 }
 0x4e4   : > { %v4372_v47 = vmax.f32 %v4356_v6, 0.0  ;;  %v4357_v61 = vadd.f32 %v5667_v50, %v7311_v39 }
 0x4e5   : > { %v4370_v57 = vmax.f32 %v4354_v37, 0.0  ;;  %v4355_v52 = vadd.f32 %v5668_v63, %v7311_v39 }
 0x4e6   : > { %4388 = vst.msk [vmem:[%s7320_s13 + $0x30] sm:$0xff] %vm290_vm3, %v4372_v47  ;;  %v4373_v53 = vmax.f32 %v4357_v61, 0.0 }
 0x4e7   : > { %4386 = vst.msk [vmem:[%s7320_s13 + $0x20] sm:$0xff] %vm290_vm3, %v4370_v57  ;;  %v4371_v16 = vmax.f32 %v4355_v52, 0.0  ;;  %v5647_v28 = vpop.f32.mrb[32].mxu1 }
 0x4e8   : > { %4389 = vst.msk [vmem:[%s7320_s13 + $0x38] sm:$0xff] %vm290_vm3, %v4373_v53  ;;  %v4360_v60 = vadd.f32 %v5647_v28, %v7311_v39  ;;  %v4297_v5 = vpop.f32.mrb[33].mxu1 }
 0x4e9   : > { %4387 = vst.msk [vmem:[%s7320_s13 + $0x28] sm:$0xff] %vm290_vm3, %v4371_v16  ;;  %v4358_v10 = vadd.f32 %v7311_v39, %v4297_v5  ;;  %v5648_v54 = vpop.f32.mrb[34].mxu1 }
 0x4ea   : > { %v4376_v7 = vmax.f32 %v4360_v60, 0.0  ;;  %v4361_v41 = vadd.f32 %v5648_v54, %v7311_v39  ;;  %v4300_v1 = vpop.f32.mrb[35].mxu1 }
 0x4eb   : > { %v4374_v59 = vmax.f32 %v4358_v10, 0.0  ;;  %v4359_v13 = vadd.f32 %v7311_v39, %v4300_v1 }
 0x4ec   : > { %4392 = vst.msk [vmem:[%s7320_s13 + $0x50] sm:$0xff] %vm290_vm3, %v4376_v7  ;;  %v4377_v40 = vmax.f32 %v4361_v41, 0.0 }
 0x4ed   : > { %4390 = vst.msk [vmem:[%s7320_s13 + $0x40] sm:$0xff] %vm290_vm3, %v4374_v59  ;;  %v4375_v35 = vmax.f32 %v4359_v13, 0.0 }
 0x4ee   : > { %4393 = vst.msk [vmem:[%s7320_s13 + $0x58] sm:$0xff] %vm290_vm3, %v4377_v40 }
 0x4ef   : > { %4391 = vst.msk [vmem:[%s7320_s13 + $0x48] sm:$0xff] %vm290_vm3, %v4375_v35  ;;  %v5651_v21 = vpop.f32.mrb[36].mxu1 }
 0x4f0   : > { %v4364_v38 = vadd.f32 %v5651_v21, %v7311_v39  ;;  %v4313_v12 = vpop.f32.mrb[37].mxu1 }
 0x4f1   : > { %v4362_v14 = vadd.f32 %v7311_v39, %v4313_v12  ;;  %v5652_v31 = vpop.f32.mrb[38].mxu1 }
 0x4f2   : > { %v4380_v24 = vmax.f32 %v4364_v38, 0.0  ;;  %v4365_v56 = vadd.f32 %v5652_v31, %v7311_v39  ;;  %v4316_v42 = vpop.f32.mrb[39].mxu1 }
 0x4f3   : > { %v4378_v48 = vmax.f32 %v4362_v14, 0.0  ;;  %v4363_v20 = vadd.f32 %v7311_v39, %v4316_v42 }
 0x4f4   : > { %4396 = vst.msk [vmem:[%s7320_s13 + $0x70] sm:$0xff] %vm290_vm3, %v4380_v24  ;;  %v4381_v25 = vmax.f32 %v4365_v56, 0.0 }
 0x4f5   : > { %4394 = vst.msk [vmem:[%s7320_s13 + $0x60] sm:$0xff] %vm290_vm3, %v4378_v48  ;;  %v4379_v36 = vmax.f32 %v4363_v20, 0.0 }
 0x4f6   : > { %4397 = vst.msk [vmem:[%s7320_s13 + $0x78] sm:$0xff] %vm290_vm3, %v4381_v25 }
 0x4f7   : > { %4395 = vst.msk [vmem:[%s7320_s13 + $0x68] sm:$0xff] %vm290_vm3, %v4379_v36 }
 0x4f8 PF: > { %s17_s24 = sadd.s32 1, %s5984_s24  }
 0x4f9   : > { %p14_p5 = scmp.ge.s32.totalorder %s17_s24, 4  }
 0x4fb   :  { %16 = sbr.rel (!%p14_p5) target bundleno = 1 (0x1), region = 92 }

</bundles_post_ra>
